<compile_context>
chip_gen: v6e
topology: v6e:2x2x1
jax: 0.10.0
libtpu: 0.0.40
codegen_flags: <defaults>
</compile_context>

<pallas_src>
import jax
import jax.numpy as jnp
from jax.experimental import pallas as pl
from jax.experimental.pallas import tpu as pltpu

LANE = 128      # TPU lane width; hidden feature dims padded to this
HIDDEN = 24     # logical hidden width of the DQN


def _cdiv(a, b):
    return -(-a // b)


def _round_up(a, m):
    return _cdiv(a, m) * m


def dqn_kernel(x_ref, w1_ref, b1_ref, w2_ref, b2_ref, w3_ref, b3_ref, o_ref):
    # x_ref: (TILE_B, in_dim) f32; weights bf16 (128-wide padded);
    # biases f32 (1, 128); o_ref f32 (TILE_B, out_dim).
    x = x_ref[...].astype(jnp.bfloat16)               # in-kernel cast (VPU, free slot)
    h1 = jnp.dot(x, w1_ref[...], preferred_element_type=jnp.float32) + b1_ref[...]
    h1 = jnp.maximum(h1, 0.0)                         # relu(fc1(x))  (f32)
    h2 = jnp.dot(h1.astype(jnp.bfloat16), w2_ref[...],
                 preferred_element_type=jnp.float32) + b2_ref[...]
    h2 = jnp.maximum(h2, 0.0)                         # relu(fc2(x))  (f32)
    out = jnp.dot(h2.astype(jnp.bfloat16), w3_ref[...],
                  preferred_element_type=jnp.float32) + b3_ref[...]
    # Store only the logical out_dim columns (narrow writeback; padded lanes are
    # never written to HBM).
    o_ref[...] = out[:, : o_ref.shape[-1]]


def dqn_forward(x, params, tile_b=1024):
    """x: (batch, input_dim) float32.  Returns (batch, output_dim) float32."""
    w1, b1, w2, b2, w3, b3 = (params[k] for k in ("w1", "b1", "w2", "b2", "w3", "b3"))
    out_dim = params["out_dim"]
    batch, in_dim = x.shape

    assert in_dim == w1.shape[0], "x feature dim must match fc1 fan-in"
    assert out_dim <= LANE, "output_dim must be <= 128 (single lane group)"

    # Tile selection: always a multiple of 16 (bf16 sublane packing), always an
    # even number of grid steps (keeps both v7x TensorCores busy; negligible on
    # v5e/v6e).  Small batches collapse to exactly 2 steps.
    tile_b = max(16, (int(tile_b) // 16) * 16)
    pb0 = _round_up(batch, 16)
    num_tiles = max(2, _cdiv(pb0, tile_b))
    if num_tiles % 2:
        num_tiles += 1
    tile = _round_up(max(8, _cdiv(pb0, num_tiles)), 16)
    padded_batch = num_tiles * tile

    if padded_batch != batch:
        x = jnp.pad(x, ((0, padded_batch - batch), (0, 0)))

    resident = lambda i: (0, 0)   # weights/biases: same block every step -> VMEM-resident

    flops = 2 * padded_batch * (in_dim * LANE + 2 * LANE * LANE)
    bytes_accessed = (
        padded_batch * in_dim * 4                       # x (f32)
        + (in_dim + 2 * LANE) * LANE * 2                # bf16 weights
        + 3 * LANE * 4                                  # f32 biases
        + padded_batch * out_dim * 4                    # f32 output
    )

    out = pl.pallas_call(
        dqn_kernel,
        out_shape=jax.ShapeDtypeStruct((padded_batch, out_dim), jnp.float32),
        grid=(num_tiles,),
        in_specs=[
            pl.BlockSpec((tile, in_dim), lambda i: (i, 0)),   # x: tiled over batch
            pl.BlockSpec(w1.shape, resident),
            pl.BlockSpec(b1.shape, resident),
            pl.BlockSpec(w2.shape, resident),
            pl.BlockSpec(b2.shape, resident),
            pl.BlockSpec(w3.shape, resident),
            pl.BlockSpec(b3.shape, resident),
        ],
        out_specs=pl.BlockSpec((tile, out_dim), lambda i: (i, 0)),
        compiler_params=pltpu.CompilerParams(dimension_semantics=("parallel",)),
        cost_estimate=pl.CostEstimate(
            flops=flops, transcendentals=0, bytes_accessed=bytes_accessed),
    )(x, w1, b1, w2, b2, w3, b3)

    # Only a batch-row slice remains (8 bytes/row), and only when padding was needed.
    return out if padded_batch == batch else out[:batch]


def init_dqn_params(key, input_dim, output_dim, hidden=HIDDEN):
    """PyTorch-style Linear init U(-1/sqrt(fan_in), 1/sqrt(fan_in)).

    Kernel params are stored pre-transposed (in, out), zero-padded to 128-wide
    feature dims, weights in bf16, biases in f32 (1, 128).  Raw f32 unpadded
    copies are kept under "raw" for the reference check.
    """
    def linear(k, fan_in, fan_out):
        kw, kb = jax.random.split(k)
        bound = 1.0 / jnp.sqrt(fan_in)
        w = jax.random.uniform(kw, (fan_in, fan_out), jnp.float32, -bound, bound)
        b = jax.random.uniform(kb, (fan_out,), jnp.float32, -bound, bound)
        return w, b

    k1, k2, k3 = jax.random.split(key, 3)
    w1, b1 = linear(k1, input_dim, hidden)
    w2, b2 = linear(k2, hidden, hidden)
    w3, b3 = linear(k3, hidden, output_dim)

    def pad_w(w, rows, cols):
        return jnp.zeros((rows, cols), jnp.float32).at[: w.shape[0], : w.shape[1]].set(w)

    def pad_b(b, cols):
        return jnp.zeros((1, cols), jnp.float32).at[0, : b.shape[0]].set(b)

    return {
        "w1": pad_w(w1, input_dim, LANE).astype(jnp.bfloat16),
        "b1": pad_b(b1, LANE),
        "w2": pad_w(w2, LANE, LANE).astype(jnp.bfloat16),
        "b2": pad_b(b2, LANE),
        "w3": pad_w(w3, LANE, LANE).astype(jnp.bfloat16),
        "b3": pad_b(b3, LANE),
        "out_dim": output_dim,
        "raw": {"w1": w1, "b1": b1, "w2": w2, "b2": b2, "w3": w3, "b3": b3},
    }


def dqn_reference(x, raw):
    """Plain-JAX f32 reference (unpadded weights)."""
    h1 = jnp.maximum(x @ raw["w1"] + raw["b1"], 0.0)
    h2 = jnp.maximum(h1 @ raw["w2"] + raw["b2"], 0.0)
    return h2 @ raw["w3"] + raw["b3"]


if __name__ == "__main__":
    key = jax.random.PRNGKey(0)
    k_params, k_x = jax.random.split(key)

    # CartPole dims (state=4, actions=2).
    input_dim, output_dim = 4, 2
    params = init_dqn_params(k_params, input_dim, output_dim)

    # Replay-buffer-sized batch: exercises the 2-step even grid (1024 -> 2 x 512).
    batch = 1024
    x = jax.random.normal(k_x, (batch, input_dim), jnp.float32)
    out = jax.block_until_ready(dqn_forward(x, params))
    ref = dqn_reference(x, params["raw"])
    assert out.shape == (batch, output_dim)
    max_err = float(jnp.max(jnp.abs(out - ref)))
    assert max_err < 5e-2, f"mismatch vs f32 reference (max abs err {max_err})"

    # Small ragged batch: exercises the padding + small-batch (2-step) path.
    xs = x[:33]
    outs = jax.block_until_ready(dqn_forward(xs, params))
    refs = dqn_reference(xs, params["raw"])
    assert outs.shape == (33, output_dim)
    max_err_s = float(jnp.max(jnp.abs(outs - refs)))
    assert max_err_s < 5e-2, f"mismatch on small batch (max abs err {max_err_s})"

    print("KERNEL_OK")
</pallas_src>

<mosaic_0001>
module attributes {stable_mosaic.version = 11 : i64} {
  func.func @dqn_kernel(%arg0: i32, %arg1: memref<512x4xf32, #tpu.memory_space<vmem>>, %arg2: memref<4x128xbf16, #tpu.memory_space<vmem>>, %arg3: memref<1x128xf32, #tpu.memory_space<vmem>>, %arg4: memref<128x128xbf16, #tpu.memory_space<vmem>>, %arg5: memref<1x128xf32, #tpu.memory_space<vmem>>, %arg6: memref<128x128xbf16, #tpu.memory_space<vmem>>, %arg7: memref<1x128xf32, #tpu.memory_space<vmem>>, %arg8: memref<512x2xf32, #tpu.memory_space<vmem>>) attributes {dimension_semantics = [#tpu.dimension_semantics<parallel>], iteration_bounds = array<i64: 2>, scalar_prefetch = 0 : i64, scratch_operands = 0 : i64, tpu.core_type = #tpu.core_type<tc>, window_params = [{transform_indices = @transform_0, window_bounds = array<i64: 512, 4>}, {pipeline_mode = #tpu.pipeline_mode<synchronous>, transform_indices = @transform_1, window_bounds = array<i64: 4, 128>}, {pipeline_mode = #tpu.pipeline_mode<synchronous>, transform_indices = @transform_2, window_bounds = array<i64: 1, 128>}, {pipeline_mode = #tpu.pipeline_mode<synchronous>, transform_indices = @transform_3, window_bounds = array<i64: 128, 128>}, {pipeline_mode = #tpu.pipeline_mode<synchronous>, transform_indices = @transform_4, window_bounds = array<i64: 1, 128>}, {pipeline_mode = #tpu.pipeline_mode<synchronous>, transform_indices = @transform_5, window_bounds = array<i64: 128, 128>}, {pipeline_mode = #tpu.pipeline_mode<synchronous>, transform_indices = @transform_6, window_bounds = array<i64: 1, 128>}, {transform_indices = @transform_7, window_bounds = array<i64: 512, 2>}]} {
    %c0 = arith.constant 0 : index
    %c0_0 = arith.constant 0 : index
    %0 = vector.load %arg1[%c0, %c0_0] : memref<512x4xf32, #tpu.memory_space<vmem>>, vector<512x4xf32>
    %1 = arith.truncf %0 : vector<512x4xf32> to vector<512x4xbf16>
    %c0_1 = arith.constant 0 : index
    %c0_2 = arith.constant 0 : index
    %2 = vector.load %arg2[%c0_1, %c0_2] : memref<4x128xbf16, #tpu.memory_space<vmem>>, vector<4x128xbf16>
    %cst = arith.constant dense<0.000000e+00> : vector<512x128xf32>
    %3 = tpu.matmul %1, %2, %cst {dimension_numbers = #tpu.dot_dimension_numbers<[1], [0], [0], [1], [0, 0, 1, 1], [], []>} : vector<512x4xbf16>, vector<4x128xbf16>, vector<512x128xf32> -> vector<512x128xf32>
    %c0_3 = arith.constant 0 : index
    %c0_4 = arith.constant 0 : index
    %4 = vector.load %arg3[%c0_3, %c0_4] : memref<1x128xf32, #tpu.memory_space<vmem>>, vector<1x128xf32>
    %5 = vector.broadcast %4 : vector<1x128xf32> to vector<512x128xf32>
    %6 = arith.addf %3, %5 : vector<512x128xf32>
    %cst_5 = arith.constant 0.000000e+00 : f32
    %7 = vector.broadcast %cst_5 : f32 to vector<512x128xf32>
    %8 = arith.maximumf %6, %7 : vector<512x128xf32>
    %9 = arith.truncf %8 : vector<512x128xf32> to vector<512x128xbf16>
    %c0_6 = arith.constant 0 : index
    %c0_7 = arith.constant 0 : index
    %10 = vector.load %arg4[%c0_6, %c0_7] : memref<128x128xbf16, #tpu.memory_space<vmem>>, vector<128x128xbf16>
    %cst_8 = arith.constant dense<0.000000e+00> : vector<512x128xf32>
    %11 = tpu.matmul %9, %10, %cst_8 {dimension_numbers = #tpu.dot_dimension_numbers<[1], [0], [0], [1], [0, 0, 1, 1], [], []>} : vector<512x128xbf16>, vector<128x128xbf16>, vector<512x128xf32> -> vector<512x128xf32>
    %c0_9 = arith.constant 0 : index
    %c0_10 = arith.constant 0 : index
    %12 = vector.load %arg5[%c0_9, %c0_10] : memref<1x128xf32, #tpu.memory_space<vmem>>, vector<1x128xf32>
    %13 = vector.broadcast %12 : vector<1x128xf32> to vector<512x128xf32>
    %14 = arith.addf %11, %13 : vector<512x128xf32>
    %cst_11 = arith.constant 0.000000e+00 : f32
    %15 = vector.broadcast %cst_11 : f32 to vector<512x128xf32>
    %16 = arith.maximumf %14, %15 : vector<512x128xf32>
    %17 = arith.truncf %16 : vector<512x128xf32> to vector<512x128xbf16>
    %c0_12 = arith.constant 0 : index
    %c0_13 = arith.constant 0 : index
    %18 = vector.load %arg6[%c0_12, %c0_13] : memref<128x128xbf16, #tpu.memory_space<vmem>>, vector<128x128xbf16>
    %cst_14 = arith.constant dense<0.000000e+00> : vector<512x128xf32>
    %19 = tpu.matmul %17, %18, %cst_14 {dimension_numbers = #tpu.dot_dimension_numbers<[1], [0], [0], [1], [0, 0, 1, 1], [], []>} : vector<512x128xbf16>, vector<128x128xbf16>, vector<512x128xf32> -> vector<512x128xf32>
    %c0_15 = arith.constant 0 : index
    %c0_16 = arith.constant 0 : index
    %20 = vector.load %arg7[%c0_15, %c0_16] : memref<1x128xf32, #tpu.memory_space<vmem>>, vector<1x128xf32>
    %21 = vector.broadcast %20 : vector<1x128xf32> to vector<512x128xf32>
    %22 = arith.addf %19, %21 : vector<512x128xf32>
    %23 = vector.extract_strided_slice %22 {offsets = [0, 0], sizes = [512, 2], strides = [1, 1]} : vector<512x128xf32> to vector<512x2xf32>
    %c0_17 = arith.constant 0 : index
    %c0_18 = arith.constant 0 : index
    %24 = vector.load %arg8[%c0_17, %c0_18] : memref<512x2xf32, #tpu.memory_space<vmem>>, vector<512x2xf32>
    tpu.vector_store %arg8[%c0_17, %c0_18], %23 {strides = array<i32>} : memref<512x2xf32, #tpu.memory_space<vmem>>, vector<512x2xf32>,
    return
  }
  func.func @transform_0(%arg0: i32) -> (i32, i32) {
    %c0_i32 = arith.constant 0 : i32
    %c0_i32_0 = arith.constant 0 : i32
    return %arg0, %c0_i32 : i32, i32
  }
  func.func @transform_1(%arg0: i32) -> (i32, i32) {
    %c0_i32 = arith.constant 0 : i32
    %c0_i32_0 = arith.constant 0 : i32
    %c0_i32_1 = arith.constant 0 : i32
    return %c0_i32, %c0_i32_0 : i32, i32
  }
  func.func @transform_2(%arg0: i32) -> (i32, i32) {
    %c0_i32 = arith.constant 0 : i32
    %c0_i32_0 = arith.constant 0 : i32
    %c0_i32_1 = arith.constant 0 : i32
    return %c0_i32, %c0_i32_0 : i32, i32
  }
  func.func @transform_3(%arg0: i32) -> (i32, i32) {
    %c0_i32 = arith.constant 0 : i32
    %c0_i32_0 = arith.constant 0 : i32
    %c0_i32_1 = arith.constant 0 : i32
    return %c0_i32, %c0_i32_0 : i32, i32
  }
  func.func @transform_4(%arg0: i32) -> (i32, i32) {
    %c0_i32 = arith.constant 0 : i32
    %c0_i32_0 = arith.constant 0 : i32
    %c0_i32_1 = arith.constant 0 : i32
    return %c0_i32, %c0_i32_0 : i32, i32
  }
  func.func @transform_5(%arg0: i32) -> (i32, i32) {
    %c0_i32 = arith.constant 0 : i32
    %c0_i32_0 = arith.constant 0 : i32
    %c0_i32_1 = arith.constant 0 : i32
    return %c0_i32, %c0_i32_0 : i32, i32
  }
  func.func @transform_6(%arg0: i32) -> (i32, i32) {
    %c0_i32 = arith.constant 0 : i32
    %c0_i32_0 = arith.constant 0 : i32
    %c0_i32_1 = arith.constant 0 : i32
    return %c0_i32, %c0_i32_0 : i32, i32
  }
  func.func @transform_7(%arg0: i32) -> (i32, i32) {
    %c0_i32 = arith.constant 0 : i32
    %c0_i32_0 = arith.constant 0 : i32
    return %arg0, %c0_i32 : i32, i32
  }
}

</mosaic_0001>

<bundles_post_ra>
// kernel: tpu_custom_call.1
= control target key start
LH: loop header
LB: loop body
LE: loop exit
PB: predicated region body
PF: predicated region fallthrough
CT: control target
= control target key end

     0   :  { %s2287_s24 = smov 0   ;;  %s2857_s0 = inlined_call_operand.vmem [shape: f32[1024,4], index: 0, kind: input, shape index: {}]   ;;  %s2858_s1 = inlined_call_operand.vmem [shape: bf16[4,128], index: 1, kind: input, shape index: {}]   ;;  %s2859_s2 = inlined_call_operand.vmem [shape: f32[1,128], index: 2, kind: input, shape index: {}]   ;;  %s2860_s3 = inlined_call_operand.vmem [shape: bf16[128,128], index: 3, kind: input, shape index: {}]   ;;  %s2861_s4 = inlined_call_operand.vmem [shape: f32[1,128], index: 4, kind: input, shape index: {}]   ;;  %s2862_s5 = inlined_call_operand.vmem [shape: bf16[128,128], index: 5, kind: input, shape index: {}]   ;;  %s2863_s6 = inlined_call_operand.vmem [shape: f32[1,128], index: 6, kind: input, shape index: {}]   ;;  %s2864_s7 = inlined_call_operand.vmem [shape: f32[1024,2], index: 7, kind: output, shape index: {}]  }
   0x1 LB: > { %s1810_s25 = sadd.s32 4294967295, %s2245_s24   ;;  %p1814_p0 = scmp.ge.s32.totalorder %s2245_s24, 1  ;;  %s2245_s24 = sphi %s2287_s24, %s17_s24  }
   0x2   : > { %p238_p1 = scmp.lt.s32.totalorder %s2245_s24, 3 }
   0x4   : > { %p239_p2 = pnand %p1814_p0, %p238_p1 }
   0x5   : > { %s1815_s28 = sshll.u32 (!%p239_p2), %s1810_s25, 6 }
   0x6   : > { %242 = sbr.rel (%p239_p2) target bundleno = 752 (0x2f0), region = 48  ;;  %p271_p3 = scmp.lt.s32.totalorder (!%p239_p2), %s1815_s28, 127 }
   0xb   : > { %v379_v0 = vld [vmem:[%s2858_s1] sm:$0x3]  ;;  %vm484_vm0 = vcmask 1041408   ;;  %v2223_v1 = vld [vmem:[%s2860_s3 + $0x38] sm:$0xff]   ;;  %s2866_s28 = smov (!%p271_p3, %s1815_s28), 127  ;;  %vm387_vm1 = vcmask 31744  }
   0xc   : > { %2213 = vmatprep.subr.msk.bf16.mxu0 %vm484_vm0, %v379_v0  ;;  %v486_v2 = vsel %vm484_vm0, %v379_v0, 0  ;;  %2214 = vmatprep.subr.msk.bf16.mxu1 %vm484_vm0, %v379_v0  ;;  %s1816_s8 = sshll.u32 %s2866_s28, 3  ;;  %v2224_v29 = vld [vmem:[%s2860_s3 + $0x30] sm:$0xff]   ;;  %v2225_v38 = vld [vmem:[%s2860_s3 + $0x28] sm:$0xff]   ;;  %v2226_v40 = vld [vmem:[%s2860_s3 + $0x20] sm:$0xff]   ;;  %vm1689_vm2 = vcmask 15360  }
   0xd   : > { %1986 = vmatpush3.bf16.msra.mxu0 %v486_v2  ;;  %2212 = vmatpush3.bf16.msra.mxu1 %v486_v2  ;;  %s2309_s11 = scalar_lea.vmem %s2857_s0, %s1816_s8  ;;  %v2227_v50 = vld [vmem:[%s2860_s3 + $0x18] sm:$0xff]   ;;  %v2228_v57 = vld [vmem:[%s2860_s3 + $0x10] sm:$0xff]   ;;  %v2229_v2 = vld [vmem:[%s2860_s3 + $0x8] sm:$0xff]   ;;  %s2660_s10 = scalar_lea.vmem %s2864_s7, %s1816_s8 }
   0xe   : > { %2051 = vmatprep.subr.bf16.mxu1 %v2223_v1  ;;  %v283_v3 = vld [vmem:[%s2309_s11] sm:$0xff]  ;;  %v284_v4 = vld [vmem:[%s2309_s11 + $0x8] sm:$0xff]  ;;  %v285_v5 = vld [vmem:[%s2309_s11 + $0x10] sm:$0xff] }
   0xf   : > { %v347_v6 = vpack.c.bf16 %v284_v4, %v283_v3  ;;  %v286_v7 = vld [vmem:[%s2309_s11 + $0x18] sm:$0xff]  ;;  %v287_v8 = vld [vmem:[%s2309_s11 + $0x20] sm:$0xff]  ;;  %v288_v9 = vld [vmem:[%s2309_s11 + $0x28] sm:$0xff] }
  0x10   : > { %v348_v10 = vpack.c.bf16 %v286_v7, %v285_v5  ;;  %v349_v11 = vpack.c.bf16 %v288_v9, %v287_v8  ;;  %v289_v12 = vld [vmem:[%s2309_s11 + $0x30] sm:$0xff]  ;;  %v290_v13 = vld [vmem:[%s2309_s11 + $0x38] sm:$0xff]  ;;  %v291_v14 = vld [vmem:[%s2309_s11 + $0x40] sm:$0xff] }
  0x11   : > { %1987 = vmatprep.mubr.msk.bf16.mxu0 %vm387_vm1, %v347_v6  ;;  %v292_v15 = vld [vmem:[%s2309_s11 + $0x48] sm:$0xff]  ;;  %v350_v16 = vpack.c.bf16 %v290_v13, %v289_v12  ;;  %v315_v18 = vld [vmem:[%s2309_s11 + $0x100] sm:$0xff]  ;;  %v317_v20 = vld [vmem:[%s2309_s11 + $0x110] sm:$0xff] }
  0x12   : > { %1988 = vmatmul.mubr.msk.bf16.vlgmr.msra.gmra.mxu0 %vm387_vm1, %v348_v10  ;;  %v351_v17 = vpack.c.bf16 %v292_v15, %v291_v14  ;;  %v316_v19 = vld [vmem:[%s2309_s11 + $0x108] sm:$0xff]  ;;  %v318_v21 = vld [vmem:[%s2309_s11 + $0x118] sm:$0xff]  ;;  %v319_v24 = vld [vmem:[%s2309_s11 + $0x120] sm:$0xff] }
  0x13   : > { %1991 = vmatprep.mubr.msk.bf16.mxu0 %vm387_vm1, %v349_v11  ;;  %v363_v22 = vpack.c.bf16 %v316_v19, %v315_v18  ;;  %v364_v23 = vpack.c.bf16 %v318_v21, %v317_v20  ;;  %v320_v25 = vld [vmem:[%s2309_s11 + $0x128] sm:$0xff]  ;;  %v293_v26 = vld [vmem:[%s2309_s11 + $0x50] sm:$0xff]  ;;  %v294_v27 = vld [vmem:[%s2309_s11 + $0x58] sm:$0xff] }
  0x14   : > { %v365_v28 = vpack.c.bf16 %v320_v25, %v319_v24  ;;  %v295_v30 = vld [vmem:[%s2309_s11 + $0x60] sm:$0xff]  ;;  %v296_v31 = vld [vmem:[%s2309_s11 + $0x68] sm:$0xff]  ;;  %v352_v32 = vpack.c.bf16 %v294_v27, %v293_v26  ;;  %v321_v33 = vld [vmem:[%s2309_s11 + $0x130] sm:$0xff] }
  0x15   : > { %2019 = vmatprep.mubr.msk.bf16.mxu1 %vm387_vm1, %v363_v22  ;;  %v322_v34 = vld [vmem:[%s2309_s11 + $0x138] sm:$0xff]  ;;  %v353_v35 = vpack.c.bf16 %v296_v31, %v295_v30  ;;  %v323_v36 = vld [vmem:[%s2309_s11 + $0x140] sm:$0xff]  ;;  %v324_v37 = vld [vmem:[%s2309_s11 + $0x148] sm:$0xff] }
  0x16   : > { %2020 = vmatmul.mubr.msk.bf16.vlgmr.msra.gmra.mxu1 %vm387_vm1, %v364_v23  ;;  %v366_v39 = vpack.c.bf16 %v322_v34, %v321_v33  ;;  %v297_v41 = vld [vmem:[%s2309_s11 + $0x70] sm:$0xff]  ;;  %v298_v42 = vld [vmem:[%s2309_s11 + $0x78] sm:$0xff]  ;;  %v299_v43 = vld [vmem:[%s2309_s11 + $0x80] sm:$0xff]  ;;  %v367_v44 = vpack.c.bf16 %v324_v37, %v323_v36 }
  0x17   : > { %2023 = vmatprep.mubr.msk.bf16.mxu1 %vm387_vm1, %v365_v28  ;;  %2052 = vmatpush3.bf16.msra.mxu1 %v2223_v1  ;;  %v300_v45 = vld [vmem:[%s2309_s11 + $0x88] sm:$0xff]  ;;  %v325_v46 = vld [vmem:[%s2309_s11 + $0x150] sm:$0xff]  ;;  %v326_v47 = vld [vmem:[%s2309_s11 + $0x158] sm:$0xff]  ;;  %v354_v51 = vpack.c.bf16 %v298_v42, %v297_v41 }
  0x18   : > { %2053 = vmatprep.subr.bf16.mxu1 %v2224_v29  ;;  %v327_v48 = vld [vmem:[%s2309_s11 + $0x160] sm:$0xff]  ;;  %v328_v49 = vld [vmem:[%s2309_s11 + $0x168] sm:$0xff]  ;;  %v355_v52 = vpack.c.bf16 %v300_v45, %v299_v43  ;;  %v368_v53 = vpack.c.bf16 %v326_v47, %v325_v46  ;;  %v301_v55 = vld [vmem:[%s2309_s11 + $0x90] sm:$0xff] }
  0x19   : > { %v369_v54 = vpack.c.bf16 %v328_v49, %v327_v48  ;;  %v302_v56 = vld [vmem:[%s2309_s11 + $0x98] sm:$0xff]  ;;  %v303_v58 = vld [vmem:[%s2309_s11 + $0xa0] sm:$0xff]  ;;  %v304_v59 = vld [vmem:[%s2309_s11 + $0xa8] sm:$0xff] }
  0x1a   : > { %1992 = vmatmul.mubr.msk.bf16.gmra.mxu0 %vm387_vm1, %v350_v16  ;;  %v356_v60 = vpack.c.bf16 %v302_v56, %v301_v55  ;;  %v329_v61 = vld [vmem:[%s2309_s11 + $0x170] sm:$0xff]  ;;  %v330_v62 = vld [vmem:[%s2309_s11 + $0x178] sm:$0xff]  ;;  %v357_v63 = vpack.c.bf16 %v304_v59, %v303_v58  ;;  %v331_v0 = vld [vmem:[%s2309_s11 + $0x180] sm:$0xff] }
  0x1b   : > { %1995 = vmatprep.mubr.msk.bf16.mxu0 %vm387_vm1, %v351_v17  ;;  %2054 = vmatpush3.bf16.msra.mxu1 %v2224_v29  ;;  %v332_v1 = vld [vmem:[%s2309_s11 + $0x188] sm:$0xff]  ;;  %v370_v3 = vpack.c.bf16 %v330_v62, %v329_v61  ;;  %v305_v5 = vld [vmem:[%s2309_s11 + $0xb0] sm:$0xff]  ;;  %v306_v6 = vld [vmem:[%s2309_s11 + $0xb8] sm:$0xff] }
  0x1c   : > { %2055 = vmatprep.subr.bf16.mxu1 %v2225_v38  ;;  %v371_v4 = vpack.c.bf16 %v332_v1, %v331_v0  ;;  %v307_v7 = vld [vmem:[%s2309_s11 + $0xc0] sm:$0xff]  ;;  %v308_v8 = vld [vmem:[%s2309_s11 + $0xc8] sm:$0xff]  ;;  %v358_v9 = vpack.c.bf16 %v306_v6, %v305_v5  ;;  %v333_v10 = vld [vmem:[%s2309_s11 + $0x190] sm:$0xff] }
  0x1d   : > { %v334_v11 = vld [vmem:[%s2309_s11 + $0x198] sm:$0xff]  ;;  %v359_v12 = vpack.c.bf16 %v308_v8, %v307_v7  ;;  %v335_v13 = vld [vmem:[%s2309_s11 + $0x1a0] sm:$0xff]  ;;  %v336_v14 = vld [vmem:[%s2309_s11 + $0x1a8] sm:$0xff] }
  0x1e   : > { %2024 = vmatmul.mubr.msk.bf16.gmra.mxu1 %vm387_vm1, %v366_v39  ;;  %v372_v15 = vpack.c.bf16 %v334_v11, %v333_v10  ;;  %v373_v16 = vpack.c.bf16 %v336_v14, %v335_v13  ;;  %v309_v17 = vld [vmem:[%s2309_s11 + $0xd0] sm:$0xff]  ;;  %v310_v18 = vld [vmem:[%s2309_s11 + $0xd8] sm:$0xff]  ;;  %v311_v19 = vld [vmem:[%s2309_s11 + $0xe0] sm:$0xff] }
  0x1f   : > { %2027 = vmatprep.mubr.msk.bf16.mxu1 %vm387_vm1, %v367_v44  ;;  %2056 = vmatpush3.bf16.msra.mxu1 %v2225_v38  ;;  %v312_v20 = vld [vmem:[%s2309_s11 + $0xe8] sm:$0xff]  ;;  %v360_v21 = vpack.c.bf16 %v310_v18, %v309_v17  ;;  %v337_v22 = vld [vmem:[%s2309_s11 + $0x1b0] sm:$0xff]  ;;  %v338_v23 = vld [vmem:[%s2309_s11 + $0x1b8] sm:$0xff] }
  0x20   : > { %2057 = vmatprep.subr.bf16.mxu1 %v2226_v40  ;;  %v361_v24 = vpack.c.bf16 %v312_v20, %v311_v19  ;;  %v339_v25 = vld [vmem:[%s2309_s11 + $0x1c0] sm:$0xff]  ;;  %v340_v26 = vld [vmem:[%s2309_s11 + $0x1c8] sm:$0xff]  ;;  %v374_v27 = vpack.c.bf16 %v338_v23, %v337_v22  ;;  %v313_v29 = vld [vmem:[%s2309_s11 + $0xf0] sm:$0xff] }
  0x21   : > { %v375_v28 = vpack.c.bf16 %v340_v26, %v339_v25  ;;  %v314_v30 = vld [vmem:[%s2309_s11 + $0xf8] sm:$0xff]  ;;  %v343_v34 = vld [vmem:[%s2309_s11 + $0x1e0] sm:$0xff]  ;;  %v345_v38 = vld [vmem:[%s2309_s11 + $0x1f0] sm:$0xff] }
  0x22   : > { %1996 = vmatmul.mubr.msk.bf16.gmra.mxu0 %vm387_vm1, %v352_v32  ;;  %v362_v31 = vpack.c.bf16 %v314_v30, %v313_v29  ;;  %v341_v32 = vld [vmem:[%s2309_s11 + $0x1d0] sm:$0xff]  ;;  %v342_v33 = vld [vmem:[%s2309_s11 + $0x1d8] sm:$0xff]  ;;  %v2230_v41 = vld [vmem:[%s2860_s3] sm:$0xff]  }
  0x23   : > { %1999 = vmatprep.mubr.msk.bf16.mxu0 %vm387_vm1, %v353_v35  ;;  %2058 = vmatpush3.bf16.msra.mxu1 %v2226_v40  ;;  %v344_v35 = vld [vmem:[%s2309_s11 + $0x1e8] sm:$0xff]  ;;  %v376_v36 = vpack.c.bf16 %v342_v33, %v341_v32  ;;  %v346_v39 = vld [vmem:[%s2309_s11 + $0x1f8] sm:$0xff]  ;;  %v2431_v44 = vld [vmem:[%s2859_s2] ss:$0 sm:$0xff] }
  0x24   : > { %2059 = vmatprep.subr.bf16.mxu1 %v2227_v50  ;;  %v377_v37 = vpack.c.bf16 %v344_v35, %v343_v34  ;;  %v378_v40 = vpack.c.bf16 %v346_v39, %v345_v38  ;;  %v2233_v59 = vld [vmem:[%s2862_s5 + $0x28] sm:$0xff]   ;;  %v2234_v5 = vld [vmem:[%s2862_s5 + $0x20] sm:$0xff]   ;;  %v2236_v25 = vld [vmem:[%s2862_s5 + $0x10] sm:$0xff]  }
  0x25   : > { %v2237_v35 = vld [vmem:[%s2862_s5 + $0x8] sm:$0xff]  }
  0x26   : > { %2028 = vmatmul.mubr.msk.bf16.gmra.mxu1 %vm387_vm1, %v368_v53 }
  0x27   : > { %2031 = vmatprep.mubr.msk.bf16.mxu1 %vm387_vm1, %v369_v54  ;;  %2060 = vmatpush3.bf16.msra.mxu1 %v2227_v50  ;;  %v2231_v50 = vld [vmem:[%s2862_s5 + $0x38] sm:$0xff]  }
  0x28   : > { %2061 = vmatprep.subr.bf16.mxu1 %v2228_v57  ;;  %2131 = vmatprep.subr.bf16.mxu0 %v2231_v50 }
  0x29   : > { %2132 = vmatpush3.bf16.msra.mxu0 %v2231_v50 }
  0x2a   : > { %2000 = vmatmul.mubr.msk.bf16.gmra.mxu0 %vm387_vm1, %v354_v51  ;;  %v2232_v51 = vld [vmem:[%s2862_s5 + $0x30] sm:$0xff]  }
  0x2b   : > { %2003 = vmatprep.mubr.msk.bf16.mxu0 %vm387_vm1, %v355_v52  ;;  %2062 = vmatpush3.bf16.msra.mxu1 %v2228_v57 }
  0x2c   : > { %2063 = vmatprep.subr.bf16.mxu1 %v2229_v2  ;;  %2133 = vmatprep.subr.bf16.mxu0 %v2232_v51 }
  0x2d   : > { %2134 = vmatpush3.bf16.msra.mxu0 %v2232_v51 }
  0x2e   : > { %2032 = vmatmul.mubr.msk.bf16.gmra.mxu1 %vm387_vm1, %v370_v3  ;;  %2135 = vmatprep.subr.bf16.mxu0 %v2233_v59 }
  0x2f   : > { %2035 = vmatprep.mubr.msk.bf16.mxu1 %vm387_vm1, %v371_v4  ;;  %2064 = vmatpush3.bf16.msra.mxu1 %v2229_v2 }
  0x30   : > { %2065 = vmatprep.subr.bf16.mxu1 %v2230_v41 }
  0x31   : > { %2136 = vmatpush3.bf16.msra.mxu0 %v2233_v59 }
  0x32   : > { %2004 = vmatmul.mubr.msk.bf16.gmra.mxu0 %vm387_vm1, %v356_v60  ;;  %2137 = vmatprep.subr.bf16.mxu0 %v2234_v5 }
  0x33   : > { %2007 = vmatprep.mubr.msk.bf16.mxu0 %vm387_vm1, %v357_v63  ;;  %2066 = vmatpush3.bf16.msra.mxu1 %v2230_v41 }
  0x35   : > { %2138 = vmatpush3.bf16.msra.mxu0 %v2234_v5 }
  0x36   : > { %2036 = vmatmul.mubr.msk.bf16.gmra.mxu1 %vm387_vm1, %v372_v15  ;;  %v2235_v15 = vld [vmem:[%s2862_s5 + $0x18] sm:$0xff]  }
  0x37   : > { %2039 = vmatprep.mubr.msk.bf16.mxu1 %vm387_vm1, %v373_v16  ;;  %2139 = vmatprep.subr.bf16.mxu0 %v2235_v15 }
  0x39   : > { %2140 = vmatpush3.bf16.msra.mxu0 %v2235_v15 }
  0x3a   : > { %2008 = vmatmul.mubr.msk.bf16.gmra.mxu0 %vm387_vm1, %v358_v9  ;;  %2141 = vmatprep.subr.bf16.mxu0 %v2236_v25 }
  0x3b   : > { %2011 = vmatprep.mubr.msk.bf16.mxu0 %vm387_vm1, %v359_v12 }
  0x3d   : > { %2142 = vmatpush3.bf16.msra.mxu0 %v2236_v25 }
  0x3e   : > { %2040 = vmatmul.mubr.msk.bf16.gmra.mxu1 %vm387_vm1, %v374_v27  ;;  %2143 = vmatprep.subr.bf16.mxu0 %v2237_v35 }
  0x3f   : > { %2043 = vmatprep.mubr.msk.bf16.mxu1 %vm387_vm1, %v375_v28 }
  0x41   : > { %2144 = vmatpush3.bf16.msra.mxu0 %v2237_v35 }
  0x42   : > { %2012 = vmatmul.mubr.msk.bf16.gmra.mxu0 %vm387_vm1, %v360_v21 }
  0x43   : > { %2015 = vmatprep.mubr.msk.bf16.mxu0 %vm387_vm1, %v361_v24 }
  0x46   : > { %2044 = vmatmul.mubr.msk.bf16.gmra.mxu1 %vm387_vm1, %v376_v36 }
  0x47   : > { %2047 = vmatprep.mubr.msk.bf16.mxu1 %vm387_vm1, %v377_v37 }
  0x4a   : > { %2016 = vmatmul.mubr.msk.bf16.gmra.mxu0 %vm387_vm1, %v362_v31 }
  0x4e   : > { %2048 = vmatmul.mubr.msk.bf16.gmra.mxu1 %vm387_vm1, %v378_v40 }
  0xd2   : > { %v1989_v42 = vpop.f32.mrf.mxu0 }
  0xd3   : > { %v531_v48 = vadd.f32 %v1989_v42, %v2431_v44 }
  0xd4   : > { %v522_v43 = vpop.f32.mrf.mxu0 }
  0xd5   : > { %v523_v46 = vadd.f32 %v2431_v44, %v522_v43  ;;  %v779_v57 = vmax.f32 %v531_v48, 0.0 }
  0xd6   : > { %v1990_v45 = vpop.f32.mrf.mxu0  ;;  %v2446_v61 = vpop.f32.mrf.mxu1 }
  0xd7   : > { %v534_v47 = vadd.f32 %v1990_v45, %v2431_v44  ;;  %v777_v55 = vmax.f32 %v523_v46, 0.0 }
  0xd8   : > { %v525_v49 = vpop.f32.mrf.mxu0  ;;  %v2450_v2 = vpop.f32.mrf.mxu1 }
  0xd9   : > { %v526_v52 = vadd.f32 %v2431_v44, %v525_v49  ;;  %v780_v53 = vmax.f32 %v534_v47, 0.0 }
  0xda   : > { %v1993_v54 = vpop.f32.mrf.mxu0  ;;  %v2457_v7 = vpop.f32.mrf.mxu1 }
  0xdb   : > { %v778_v56 = vmax.f32 %v526_v52, 0.0  ;;  %v842_v62 = vpack.c.bf16 %v780_v53, %v779_v57  ;;  %v547_v3 = vadd.f32 %v1993_v54, %v2431_v44 }
  0xdc   : > { %v538_v58 = vpop.f32.mrf.mxu0  ;;  %v2459_v12 = vpop.f32.mrf.mxu1 }
  0xdd   : > { %v841_v60 = vpack.c.bf16 %v778_v56, %v777_v55  ;;  %v539_v0 = vadd.f32 %v2431_v44, %v538_v58  ;;  %v783_v13 = vmax.f32 %v547_v3, 0.0 }
  0xde   : > { %v1994_v63 = vpop.f32.mrf.mxu0  ;;  %v2464_v17 = vpop.f32.mrf.mxu1 }
  0xdf   : > { %v550_v1 = vadd.f32 %v1994_v63, %v2431_v44  ;;  %2067 = vmatprep.mubr.bf16.mxu1 %v841_v60  ;;  %v781_v10 = vmax.f32 %v539_v0, 0.0 }
  0xe0   : > { %v541_v4 = vpop.f32.mrf.mxu0  ;;  %2068 = vmatmul.mubr.bf16.vlgmr.msra.gmra.mxu1 %v842_v62  ;;  %v2468_v22 = vpop.f32.mrf.mxu1 }
  0xe1   : > { %v542_v6 = vadd.f32 %v2431_v44, %v541_v4  ;;  %v784_v8 = vmax.f32 %v550_v1, 0.0 }
  0xe2   : > { %v1997_v9 = vpop.f32.mrf.mxu0  ;;  %v2475_v27 = vpop.f32.mrf.mxu1 }
  0xe3   : > { %v782_v11 = vmax.f32 %v542_v6, 0.0  ;;  %v844_v18 = vpack.c.bf16 %v784_v8, %v783_v13  ;;  %v563_v23 = vadd.f32 %v1997_v9, %v2431_v44 }
  0xe4   : > { %v554_v14 = vpop.f32.mrf.mxu0  ;;  %v2477_v32 = vpop.f32.mrf.mxu1 }
  0xe5   : > { %v843_v16 = vpack.c.bf16 %v782_v11, %v781_v10  ;;  %v555_v20 = vadd.f32 %v2431_v44, %v554_v14  ;;  %v787_v33 = vmax.f32 %v563_v23, 0.0 }
  0xe6   : > { %v1998_v19 = vpop.f32.mrf.mxu0  ;;  %v2482_v37 = vpop.f32.mrf.mxu1 }
  0xe7   : > { %v566_v21 = vadd.f32 %v1998_v19, %v2431_v44  ;;  %2071 = vmatprep.mubr.bf16.mxu1 %v843_v16  ;;  %v785_v30 = vmax.f32 %v555_v20, 0.0 }
  0xe8   : > { %v557_v24 = vpop.f32.mrf.mxu0  ;;  %2072 = vmatmul.mubr.bf16.gmra.mxu1 %v844_v18  ;;  %v2486_v42 = vpop.f32.mrf.mxu1 }
  0xe9   : > { %v558_v26 = vadd.f32 %v2431_v44, %v557_v24  ;;  %v788_v28 = vmax.f32 %v566_v21, 0.0 }
  0xea   : > { %v2001_v29 = vpop.f32.mrf.mxu0  ;;  %v2490_v47 = vpop.f32.mrf.mxu1 }
  0xeb   : > { %v786_v31 = vmax.f32 %v558_v26, 0.0  ;;  %v846_v38 = vpack.c.bf16 %v788_v28, %v787_v33  ;;  %v579_v43 = vadd.f32 %v2001_v29, %v2431_v44 }
  0xec   : > { %v570_v34 = vpop.f32.mrf.mxu0  ;;  %v2492_v52 = vpop.f32.mrf.mxu1 }
  0xed   : > { %v845_v36 = vpack.c.bf16 %v786_v31, %v785_v30  ;;  %v571_v40 = vadd.f32 %v2431_v44, %v570_v34  ;;  %v791_v53 = vmax.f32 %v579_v43, 0.0 }
  0xee   : > { %v2002_v39 = vpop.f32.mrf.mxu0  ;;  %v2494_v58 = vpop.f32.mrf.mxu1 }
  0xef   : > { %v582_v41 = vadd.f32 %v2002_v39, %v2431_v44  ;;  %2075 = vmatprep.mubr.bf16.mxu1 %v845_v36  ;;  %v789_v50 = vmax.f32 %v571_v40, 0.0 }
  0xf0   : > { %v573_v45 = vpop.f32.mrf.mxu0  ;;  %2076 = vmatmul.mubr.bf16.gmra.mxu1 %v846_v38  ;;  %v2500_v4 = vpop.f32.mrf.mxu1 }
  0xf1   : > { %v574_v46 = vadd.f32 %v2431_v44, %v573_v45  ;;  %v792_v48 = vmax.f32 %v582_v41, 0.0 }
  0xf2   : > { %v2005_v49 = vpop.f32.mrf.mxu0  ;;  %v2502_v14 = vpop.f32.mrf.mxu1 }
  0xf3   : > { %v790_v51 = vmax.f32 %v574_v46, 0.0  ;;  %v848_v56 = vpack.c.bf16 %v792_v48, %v791_v53  ;;  %v595_v62 = vadd.f32 %v2005_v49, %v2431_v44  ;;  %v651_v53 = vadd.f32 %v2431_v44, %v2450_v2 }
  0xf4   : > { %v586_v54 = vpop.f32.mrf.mxu0  ;;  %v2508_v24 = vpop.f32.mrf.mxu1 }
  0xf5   : > { %v847_v55 = vpack.c.bf16 %v790_v51, %v789_v50  ;;  %v587_v59 = vadd.f32 %v2431_v44, %v586_v54  ;;  %v795_v8 = vmax.f32 %v595_v62, 0.0  ;;  %v654_v54 = vadd.f32 %v2431_v44, %v2459_v12 }
  0xf6   : > { %v2006_v57 = vpop.f32.mrf.mxu0  ;;  %v2510_v34 = vpop.f32.mrf.mxu1 }
  0xf7   : > { %v598_v60 = vadd.f32 %v2006_v57, %v2431_v44  ;;  %2079 = vmatprep.mubr.bf16.mxu1 %v847_v55  ;;  %v793_v5 = vmax.f32 %v587_v59, 0.0  ;;  %v810_v2 = vmax.f32 %v654_v54, 0.0  ;;  %v710_v54 = vadd.f32 %v2502_v14, %v2431_v44 }
  0xf8   : > { %v589_v63 = vpop.f32.mrf.mxu0  ;;  %2080 = vmatmul.mubr.bf16.gmra.mxu1 %v848_v56  ;;  %v2516_v45 = vpop.f32.mrf.mxu1 }
  0xf9   : > { %v590_v0 = vadd.f32 %v2431_v44, %v589_v63  ;;  %v796_v1 = vmax.f32 %v598_v60, 0.0 }
  0xfa   : > { %v2009_v3 = vpop.f32.mrf.mxu0  ;;  %v2522_v57 = vpop.f32.mrf.mxu1 }
  0xfb   : > { %v794_v6 = vmax.f32 %v590_v0, 0.0  ;;  %v850_v11 = vpack.c.bf16 %v796_v1, %v795_v8  ;;  %v611_v18 = vadd.f32 %v2009_v3, %v2431_v44  ;;  %v809_v0 = vmax.f32 %v651_v53, 0.0 }
  0xfc   : > { %v602_v9 = vpop.f32.mrf.mxu0  ;;  %v707_v53 = vadd.f32 %v2494_v58, %v2431_v44  ;;  %v723_v58 = vadd.f32 %v2510_v34, %v2431_v44  ;;  %v726_v14 = vadd.f32 %v2522_v57, %v2431_v44 }
  0xfd   : > { %v849_v10 = vpack.c.bf16 %v794_v6, %v793_v5  ;;  %v603_v15 = vadd.f32 %v2431_v44, %v602_v9  ;;  %v799_v28 = vmax.f32 %v611_v18, 0.0  ;;  %v717_v5 = vpop.f32.mrf.mxu1  ;;  %v662_v18 = vadd.f32 %v2457_v7, %v2431_v44 }
  0xfe   : > { %v2010_v13 = vpop.f32.mrf.mxu0  ;;  %v675_v7 = vadd.f32 %v2464_v17, %v2431_v44  ;;  %v691_v17 = vadd.f32 %v2482_v37, %v2431_v44  ;;  %v715_v37 = vadd.f32 %v2431_v44, %v2516_v45 }
  0xff   : > { %v614_v16 = vadd.f32 %v2010_v13, %v2431_v44  ;;  %2083 = vmatprep.mubr.bf16.mxu1 %v849_v10  ;;  %v797_v25 = vmax.f32 %v603_v15, 0.0  ;;  %v857_v10 = vpack.c.bf16 %v810_v2, %v809_v0  ;;  %v670_v13 = vadd.f32 %v2431_v44, %v2477_v32 }
 0x100   : > { %v605_v19 = vpop.f32.mrf.mxu0  ;;  %2084 = vmatmul.mubr.bf16.gmra.mxu1 %v850_v11  ;;  %v667_v11 = vadd.f32 %v2431_v44, %v2468_v22  ;;  %v659_v15 = vadd.f32 %v2446_v61, %v2431_v44  ;;  %v683_v32 = vadd.f32 %v2431_v44, %v2486_v42  ;;  %v686_v61 = vadd.f32 %v2431_v44, %v2492_v52 }
 0x101   : > { %v606_v20 = vadd.f32 %v2431_v44, %v605_v19  ;;  %v800_v21 = vmax.f32 %v614_v16, 0.0  ;;  %v2536_v19 = vpop.f32.mrf.mxu1  ;;  %v699_v42 = vadd.f32 %v2431_v44, %v2500_v4  ;;  %v702_v52 = vadd.f32 %v2431_v44, %v2508_v24 }
 0x102   : > { %v2013_v23 = vpop.f32.mrf.mxu0  ;;  %v819_v4 = vmax.f32 %v691_v17, 0.0  ;;  %v739_v34 = vadd.f32 %v2536_v19, %v2431_v44 }
 0x103   : > { %v798_v26 = vmax.f32 %v606_v20, 0.0  ;;  %v852_v31 = vpack.c.bf16 %v800_v21, %v799_v28  ;;  %v627_v38 = vadd.f32 %v2013_v23, %v2431_v44  ;;  %v813_v20 = vmax.f32 %v667_v11, 0.0  ;;  %v730_v22 = vpop.f32.mrf.mxu1 }
 0x104   : > { %v618_v29 = vpop.f32.mrf.mxu0  ;;  %v814_v21 = vmax.f32 %v670_v13, 0.0  ;;  %v811_v23 = vmax.f32 %v659_v15, 0.0  ;;  %v731_v45 = vadd.f32 %v2431_v44, %v730_v22 }
 0x105   : > { %v851_v30 = vpack.c.bf16 %v798_v26, %v797_v25  ;;  %v619_v35 = vadd.f32 %v2431_v44, %v618_v29  ;;  %v803_v49 = vmax.f32 %v627_v38, 0.0  ;;  %v812_v25 = vmax.f32 %v662_v18, 0.0 }
 0x106   : > { %v2014_v33 = vpop.f32.mrf.mxu0  ;;  %v859_v26 = vpack.c.bf16 %v814_v21, %v813_v20  ;;  %v678_v29 = vadd.f32 %v2475_v27, %v2431_v44  ;;  %v694_v27 = vadd.f32 %v2490_v47, %v2431_v44  ;;  %v718_v47 = vadd.f32 %v2431_v44, %v717_v5 }
 0x107   : > { %v630_v36 = vadd.f32 %v2014_v33, %v2431_v44  ;;  %2087 = vmatprep.mubr.bf16.mxu1 %v851_v30  ;;  %v801_v46 = vmax.f32 %v619_v35, 0.0  ;;  %v858_v28 = vpack.c.bf16 %v812_v25, %v811_v23  ;;  %v2042_v30 = vpop.f32.mrf.mxu1  ;;  %v818_v33 = vmax.f32 %v686_v61, 0.0 }
 0x108   : > { %v621_v39 = vpop.f32.mrf.mxu0  ;;  %2088 = vmatmul.mubr.bf16.gmra.mxu1 %v852_v31  ;;  %v817_v31 = vmax.f32 %v683_v32, 0.0  ;;  %v815_v35 = vmax.f32 %v675_v7, 0.0  ;;  %v829_v5 = vmax.f32 %v731_v45, 0.0  ;;  %v831_v21 = vmax.f32 %v739_v34, 0.0 }
 0x109   : > { %v622_v40 = vadd.f32 %v2431_v44, %v621_v39  ;;  %v804_v41 = vmax.f32 %v630_v36, 0.0  ;;  %v816_v36 = vmax.f32 %v678_v29, 0.0  ;;  %v733_v38 = vpop.f32.mrf.mxu1 }
 0x10a   : > { %v2017_v43 = vpop.f32.mrf.mxu0  ;;  %v861_v39 = vpack.c.bf16 %v818_v33, %v817_v31 }
 0x10b   : > { %v802_v48 = vmax.f32 %v622_v40, 0.0  ;;  %v854_v55 = vpack.c.bf16 %v804_v41, %v803_v49  ;;  %v643_v62 = vadd.f32 %v2017_v43, %v2431_v44  ;;  %v860_v40 = vpack.c.bf16 %v816_v36, %v815_v35  ;;  %v2045_v41 = vpop.f32.mrf.mxu1  ;;  %v2238_v43 = vld [vmem:[%s2862_s5] sm:$0xff]  }
 0x10c   : > { %v634_v50 = vpop.f32.mrf.mxu0  ;;  %v820_v49 = vmax.f32 %v694_v27, 0.0  ;;  %2145 = vmatprep.subr.bf16.mxu0 %v2238_v43  ;;  %v2584_v27 = vld [vmem:[%s2861_s4] ss:$0 sm:$0xff] }
 0x10d   : > { %v853_v51 = vpack.c.bf16 %v802_v48, %v801_v46  ;;  %v635_v59 = vadd.f32 %v2431_v44, %v634_v50  ;;  %v807_v8 = vmax.f32 %v643_v62, 0.0  ;;  %v821_v46 = vmax.f32 %v699_v42, 0.0  ;;  %v746_v50 = vpop.f32.mrf.mxu1  ;;  %2146 = vmatpush3.bf16.msra.mxu0 %v2238_v43 }
 0x10e   : > { %v2018_v56 = vpop.f32.mrf.mxu0  ;;  %v822_v48 = vmax.f32 %v702_v52, 0.0  ;;  %v824_v62 = vmax.f32 %v710_v54, 0.0  ;;  %v747_v11 = vadd.f32 %v2431_v44, %v746_v50 }
 0x10f   : > { %v646_v60 = vadd.f32 %v2018_v56, %v2431_v44  ;;  %2091 = vmatprep.mubr.bf16.mxu1 %v853_v51  ;;  %v805_v12 = vmax.f32 %v635_v59, 0.0  ;;  %v862_v51 = vpack.c.bf16 %v820_v49, %v819_v4  ;;  %v825_v56 = vmax.f32 %v715_v37, 0.0 }
 0x110   : > { %v637_v63 = vpop.f32.mrf.mxu0  ;;  %2092 = vmatmul.mubr.bf16.gmra.mxu1 %v854_v55  ;;  %v863_v24 = vpack.c.bf16 %v822_v48, %v821_v46  ;;  %v2046_v55 = vpop.f32.mrf.mxu1  ;;  %v826_v59 = vmax.f32 %v718_v47, 0.0  ;;  %v833_v18 = vmax.f32 %v747_v11, 0.0 }
 0x111   : > { %v638_v1 = vadd.f32 %v2431_v44, %v637_v63  ;;  %v808_v3 = vmax.f32 %v646_v60, 0.0  ;;  %v823_v60 = vmax.f32 %v707_v53, 0.0  ;;  %v758_v19 = vadd.f32 %v2046_v55, %v2431_v44 }
 0x112   : > { %v749_v63 = vpop.f32.mrf.mxu1  ;;  %v865_v0 = vpack.c.bf16 %v826_v59, %v825_v56 }
 0x113   : > { %v806_v6 = vmax.f32 %v638_v1, 0.0  ;;  %v856_v16 = vpack.c.bf16 %v808_v3, %v807_v8  ;;  %v734_v1 = vadd.f32 %v2431_v44, %v733_v38  ;;  %v864_v2 = vpack.c.bf16 %v824_v62, %v823_v60 }
 0x114   : > { %v2049_v3 = vpop.f32.mrf.mxu1  ;;  %v828_v8 = vmax.f32 %v726_v14, 0.0  ;;  %v750_v13 = vadd.f32 %v2431_v44, %v749_v63  ;;  %v836_v31 = vmax.f32 %v758_v19, 0.0 }
 0x115   : > { %v855_v9 = vpack.c.bf16 %v806_v6, %v805_v12  ;;  %v830_v12 = vmax.f32 %v734_v1, 0.0  ;;  %v827_v6 = vmax.f32 %v723_v58, 0.0  ;;  %v771_v36 = vadd.f32 %v2049_v3, %v2431_v44 }
 0x116   : > { %v834_v20 = vmax.f32 %v750_v13, 0.0 }
 0x117   : > { %2095 = vmatprep.mubr.bf16.mxu1 %v855_v9  ;;  %v762_v9 = vpop.f32.mrf.mxu1  ;;  %v866_v15 = vpack.c.bf16 %v828_v8, %v827_v6 }
 0x118   : > { %2096 = vmatmul.mubr.bf16.gmra.mxu1 %v856_v16  ;;  %v742_v16 = vadd.f32 %v2042_v30, %v2431_v44  ;;  %v869_v22 = vpack.c.bf16 %v834_v20, %v833_v18 }
 0x119   : > { %2099 = vmatprep.mubr.bf16.mxu1 %v857_v10  ;;  %v867_v10 = vpack.c.bf16 %v830_v12, %v829_v5  ;;  %v2050_v57 = vpop.f32.mrf.mxu1 }
 0x11a   : > { %v832_v23 = vmax.f32 %v742_v16, 0.0  ;;  %v774_v38 = vadd.f32 %v2050_v57, %v2431_v44 }
 0x11b   : > { %v765_v25 = vpop.f32.mrf.mxu1 }
 0x11c   : > { %v766_v32 = vadd.f32 %v2431_v44, %v765_v25  ;;  %v868_v61 = vpack.c.bf16 %v832_v23, %v831_v21  ;;  %v840_v42 = vmax.f32 %v774_v38, 0.0 }
 0x11e   : > { %v838_v29 = vmax.f32 %v766_v32, 0.0 }
 0x120   : > { %2100 = vmatmul.mubr.bf16.gmra.mxu1 %v858_v28  ;;  %v755_v28 = vadd.f32 %v2045_v41, %v2431_v44 }
 0x121   : > { %2103 = vmatprep.mubr.bf16.mxu1 %v859_v26  ;;  %v763_v26 = vadd.f32 %v2431_v44, %v762_v9 }
 0x122   : > { %v835_v30 = vmax.f32 %v755_v28, 0.0 }
 0x123   : > { %v837_v7 = vmax.f32 %v763_v26, 0.0 }
 0x124   : > { %v870_v35 = vpack.c.bf16 %v836_v31, %v835_v30 }
 0x125   : > { %v871_v33 = vpack.c.bf16 %v838_v29, %v837_v7 }
 0x128   : > { %2104 = vmatmul.mubr.bf16.gmra.mxu1 %v860_v40 }
 0x129   : > { %2107 = vmatprep.mubr.bf16.mxu1 %v861_v39  ;;  %v839_v39 = vmax.f32 %v771_v36, 0.0 }
 0x12b   : > { %v872_v52 = vpack.c.bf16 %v840_v42, %v839_v39 }
 0x130   : > { %2108 = vmatmul.mubr.bf16.gmra.mxu1 %v862_v51 }
 0x131   : > { %2111 = vmatprep.mubr.bf16.mxu1 %v863_v24 }
 0x138   : > { %2112 = vmatmul.mubr.bf16.gmra.mxu1 %v864_v2 }
 0x139   : > { %2115 = vmatprep.mubr.bf16.mxu1 %v865_v0 }
 0x140   : > { %2116 = vmatmul.mubr.bf16.gmra.mxu1 %v866_v15 }
 0x141   : > { %2119 = vmatprep.mubr.bf16.mxu1 %v867_v10 }
 0x148   : > { %2120 = vmatmul.mubr.bf16.gmra.mxu1 %v868_v61 }
 0x149   : > { %2123 = vmatprep.mubr.bf16.mxu1 %v869_v22 }
 0x150   : > { %2124 = vmatmul.mubr.bf16.gmra.mxu1 %v870_v35 }
 0x151   : > { %2127 = vmatprep.mubr.bf16.mxu1 %v871_v33 }
 0x158   : > { %2128 = vmatmul.mubr.bf16.gmra.mxu1 %v872_v52 }
 0x1a0   : > { %v2069_v40 = vpop.f32.mrf.mxu1 }
 0x1a1   : > { %v987_v44 = vadd.f32 %v2069_v40, %v2584_v27 }
 0x1a2   : > { %v978_v17 = vpop.f32.mrf.mxu1 }
 0x1a3   : > { %v979_v43 = vadd.f32 %v2584_v27, %v978_v17  ;;  %v1235_v47 = vmax.f32 %v987_v44, 0.0 }
 0x1a4   : > { %v2070_v41 = vpop.f32.mrf.mxu1 }
 0x1a5   : > { %v990_v46 = vadd.f32 %v2070_v41, %v2584_v27  ;;  %v1233_v24 = vmax.f32 %v979_v43, 0.0 }
 0x1a6   : > { %v981_v48 = vpop.f32.mrf.mxu1 }
 0x1a7   : > { %v982_v4 = vadd.f32 %v2584_v27, %v981_v48  ;;  %v1236_v49 = vmax.f32 %v990_v46, 0.0 }
 0x1a8   : > { %v2073_v50 = vpop.f32.mrf.mxu1 }
 0x1a9   : > { %v1234_v37 = vmax.f32 %v982_v4, 0.0  ;;  %v1298_v54 = vpack.c.bf16 %v1236_v49, %v1235_v47  ;;  %v1003_v60 = vadd.f32 %v2073_v50, %v2584_v27 }
 0x1aa   : > { %v994_v51 = vpop.f32.mrf.mxu1 }
 0x1ab   : > { %v1297_v53 = vpack.c.bf16 %v1234_v37, %v1233_v24  ;;  %v995_v56 = vadd.f32 %v2584_v27, %v994_v51  ;;  %v1239_v58 = vmax.f32 %v1003_v60, 0.0 }
 0x1ac   : > { %v2074_v55 = vpop.f32.mrf.mxu1 }
 0x1ad   : > { %v1006_v59 = vadd.f32 %v2074_v55, %v2584_v27  ;;  %2147 = vmatprep.mubr.bf16.mxu0 %v1297_v53  ;;  %v1237_v1 = vmax.f32 %v995_v56, 0.0 }
 0x1ae   : > { %v997_v62 = vpop.f32.mrf.mxu1  ;;  %2148 = vmatmul.mubr.bf16.vlgmr.msra.gmra.mxu0 %v1298_v54 }
 0x1af   : > { %v998_v63 = vadd.f32 %v2584_v27, %v997_v62  ;;  %v1240_v0 = vmax.f32 %v1006_v59, 0.0 }
 0x1b0   : > { %v2077_v45 = vpop.f32.mrf.mxu1 }
 0x1b1   : > { %v1238_v2 = vmax.f32 %v998_v63, 0.0  ;;  %v1300_v5 = vpack.c.bf16 %v1240_v0, %v1239_v58  ;;  %v1019_v9 = vadd.f32 %v2077_v45, %v2584_v27 }
 0x1b2   : > { %v1010_v14 = vpop.f32.mrf.mxu1 }
 0x1b3   : > { %v1299_v3 = vpack.c.bf16 %v1238_v2, %v1237_v1  ;;  %v1011_v6 = vadd.f32 %v2584_v27, %v1010_v14  ;;  %v1243_v57 = vmax.f32 %v1019_v9, 0.0 }
 0x1b4   : > { %v2078_v12 = vpop.f32.mrf.mxu1 }
 0x1b5   : > { %v1022_v8 = vadd.f32 %v2078_v12, %v2584_v27  ;;  %2151 = vmatprep.mubr.bf16.mxu0 %v1299_v3  ;;  %v1241_v34 = vmax.f32 %v1011_v6, 0.0 }
 0x1b6   : > { %v1013_v10 = vpop.f32.mrf.mxu1  ;;  %2152 = vmatmul.mubr.bf16.gmra.mxu0 %v1300_v5 }
 0x1b7   : > { %v1014_v11 = vadd.f32 %v2584_v27, %v1013_v10  ;;  %v1244_v13 = vmax.f32 %v1022_v8, 0.0 }
 0x1b8   : > { %v2081_v15 = vpop.f32.mrf.mxu1 }
 0x1b9   : > { %v1242_v16 = vmax.f32 %v1014_v11, 0.0  ;;  %v1302_v21 = vpack.c.bf16 %v1244_v13, %v1243_v57  ;;  %v1035_v26 = vadd.f32 %v2081_v15, %v2584_v27 }
 0x1ba   : > { %v1026_v18 = vpop.f32.mrf.mxu1 }
 0x1bb   : > { %v1301_v20 = vpack.c.bf16 %v1242_v16, %v1241_v34  ;;  %v1027_v25 = vadd.f32 %v2584_v27, %v1026_v18  ;;  %v1247_v30 = vmax.f32 %v1035_v26, 0.0 }
 0x1bc   : > { %v2082_v23 = vpop.f32.mrf.mxu1 }
 0x1bd   : > { %v1038_v22 = vadd.f32 %v2082_v23, %v2584_v27  ;;  %2155 = vmatprep.mubr.bf16.mxu0 %v1301_v20  ;;  %v1245_v7 = vmax.f32 %v1027_v25, 0.0 }
 0x1be   : > { %v1029_v32 = vpop.f32.mrf.mxu1  ;;  %2156 = vmatmul.mubr.bf16.gmra.mxu0 %v1302_v21 }
 0x1bf   : > { %v1030_v61 = vadd.f32 %v2584_v27, %v1029_v32  ;;  %v1248_v28 = vmax.f32 %v1038_v22, 0.0 }
 0x1c0   : > { %v2085_v19 = vpop.f32.mrf.mxu1 }
 0x1c1   : > { %v1246_v29 = vmax.f32 %v1030_v61, 0.0  ;;  %v1304_v35 = vpack.c.bf16 %v1248_v28, %v1247_v30  ;;  %v1051_v42 = vadd.f32 %v2085_v19, %v2584_v27 }
 0x1c2   : > { %v1042_v31 = vpop.f32.mrf.mxu1 }
 0x1c3   : > { %v1303_v33 = vpack.c.bf16 %v1246_v29, %v1245_v7  ;;  %v1043_v38 = vadd.f32 %v2584_v27, %v1042_v31  ;;  %v1251_v44 = vmax.f32 %v1051_v42, 0.0 }
 0x1c4   : > { %v2086_v36 = vpop.f32.mrf.mxu1 }
 0x1c5   : > { %v1054_v39 = vadd.f32 %v2086_v36, %v2584_v27  ;;  %2159 = vmatprep.mubr.bf16.mxu0 %v1303_v33  ;;  %v1249_v43 = vmax.f32 %v1043_v38, 0.0 }
 0x1c6   : > { %v1045_v52 = vpop.f32.mrf.mxu1  ;;  %2160 = vmatmul.mubr.bf16.gmra.mxu0 %v1304_v35 }
 0x1c7   : > { %v1046_v40 = vadd.f32 %v2584_v27, %v1045_v52  ;;  %v1252_v17 = vmax.f32 %v1054_v39, 0.0 }
 0x1c8   : > { %v2089_v41 = vpop.f32.mrf.mxu1 }
 0x1c9   : > { %v1250_v46 = vmax.f32 %v1046_v40, 0.0  ;;  %v1306_v49 = vpack.c.bf16 %v1252_v17, %v1251_v44  ;;  %v1067_v47 = vadd.f32 %v2089_v41, %v2584_v27 }
 0x1ca   : > { %v1058_v48 = vpop.f32.mrf.mxu1 }
 0x1cb   : > { %v1305_v4 = vpack.c.bf16 %v1250_v46, %v1249_v43  ;;  %v1059_v24 = vadd.f32 %v2584_v27, %v1058_v48  ;;  %v1255_v60 = vmax.f32 %v1067_v47, 0.0 }
 0x1cc   : > { %v2090_v50 = vpop.f32.mrf.mxu1 }
 0x1cd   : > { %v1070_v37 = vadd.f32 %v2090_v50, %v2584_v27  ;;  %2163 = vmatprep.mubr.bf16.mxu0 %v1305_v4  ;;  %v1253_v56 = vmax.f32 %v1059_v24, 0.0 }
 0x1ce   : > { %v1061_v51 = vpop.f32.mrf.mxu1  ;;  %2164 = vmatmul.mubr.bf16.gmra.mxu0 %v1306_v49 }
 0x1cf   : > { %v1062_v53 = vadd.f32 %v2584_v27, %v1061_v51  ;;  %v1256_v54 = vmax.f32 %v1070_v37, 0.0 }
 0x1d0   : > { %v2093_v55 = vpop.f32.mrf.mxu1 }
 0x1d1   : > { %v1254_v59 = vmax.f32 %v1062_v53, 0.0  ;;  %v1308_v0 = vpack.c.bf16 %v1256_v54, %v1255_v60  ;;  %v1083_v58 = vadd.f32 %v2093_v55, %v2584_v27 }
 0x1d2   : > { %v1074_v62 = vpop.f32.mrf.mxu1 }
 0x1d3   : > { %v1307_v63 = vpack.c.bf16 %v1254_v59, %v1253_v56  ;;  %v1075_v1 = vadd.f32 %v2584_v27, %v1074_v62  ;;  %v1259_v9 = vmax.f32 %v1083_v58, 0.0 }
 0x1d4   : > { %v2094_v45 = vpop.f32.mrf.mxu1 }
 0x1d5   : > { %v1086_v2 = vadd.f32 %v2094_v45, %v2584_v27  ;;  %2167 = vmatprep.mubr.bf16.mxu0 %v1307_v63  ;;  %v1257_v6 = vmax.f32 %v1075_v1, 0.0 }
 0x1d6   : > { %v1077_v14 = vpop.f32.mrf.mxu1  ;;  %2168 = vmatmul.mubr.bf16.gmra.mxu0 %v1308_v0 }
 0x1d7   : > { %v1078_v3 = vadd.f32 %v2584_v27, %v1077_v14  ;;  %v1260_v5 = vmax.f32 %v1086_v2, 0.0 }
 0x1d8   : > { %v2097_v12 = vpop.f32.mrf.mxu1 }
 0x1d9   : > { %v1258_v8 = vmax.f32 %v1078_v3, 0.0  ;;  %v1310_v13 = vpack.c.bf16 %v1260_v5, %v1259_v9  ;;  %v1099_v57 = vadd.f32 %v2097_v12, %v2584_v27 }
 0x1da   : > { %v1090_v10 = vpop.f32.mrf.mxu1 }
 0x1db   : > { %v1309_v11 = vpack.c.bf16 %v1258_v8, %v1257_v6  ;;  %v1091_v34 = vadd.f32 %v2584_v27, %v1090_v10  ;;  %v1263_v26 = vmax.f32 %v1099_v57, 0.0 }
 0x1dc   : > { %v2098_v15 = vpop.f32.mrf.mxu1 }
 0x1dd   : > { %v1102_v16 = vadd.f32 %v2098_v15, %v2584_v27  ;;  %2171 = vmatprep.mubr.bf16.mxu0 %v1309_v11  ;;  %v1261_v25 = vmax.f32 %v1091_v34, 0.0 }
 0x1de   : > { %v1093_v18 = vpop.f32.mrf.mxu1  ;;  %2172 = vmatmul.mubr.bf16.gmra.mxu0 %v1310_v13 }
 0x1df   : > { %v1094_v20 = vadd.f32 %v2584_v27, %v1093_v18  ;;  %v1264_v21 = vmax.f32 %v1102_v16, 0.0 }
 0x1e0   : > { %v2101_v23 = vpop.f32.mrf.mxu1 }
 0x1e1   : > { %v1262_v22 = vmax.f32 %v1094_v20, 0.0  ;;  %v1312_v28 = vpack.c.bf16 %v1264_v21, %v1263_v26  ;;  %v1115_v30 = vadd.f32 %v2101_v23, %v2584_v27 }
 0x1e2   : > { %v1106_v32 = vpop.f32.mrf.mxu1 }
 0x1e3   : > { %v1311_v61 = vpack.c.bf16 %v1262_v22, %v1261_v25  ;;  %v1107_v7 = vadd.f32 %v2584_v27, %v1106_v32  ;;  %v1267_v42 = vmax.f32 %v1115_v30, 0.0 }
 0x1e4   : > { %v2102_v19 = vpop.f32.mrf.mxu1 }
 0x1e5   : > { %v1118_v29 = vadd.f32 %v2102_v19, %v2584_v27  ;;  %2175 = vmatprep.mubr.bf16.mxu0 %v1311_v61  ;;  %v1265_v38 = vmax.f32 %v1107_v7, 0.0 }
 0x1e6   : > { %v1109_v31 = vpop.f32.mrf.mxu1  ;;  %2176 = vmatmul.mubr.bf16.gmra.mxu0 %v1312_v28 }
 0x1e7   : > { %v1110_v33 = vadd.f32 %v2584_v27, %v1109_v31  ;;  %v1268_v35 = vmax.f32 %v1118_v29, 0.0 }
 0x1e8   : > { %v2105_v36 = vpop.f32.mrf.mxu1 }
 0x1e9   : > { %v1266_v39 = vmax.f32 %v1110_v33, 0.0  ;;  %v1314_v17 = vpack.c.bf16 %v1268_v35, %v1267_v42  ;;  %v1131_v44 = vadd.f32 %v2105_v36, %v2584_v27 }
 0x1ea   : > { %v1122_v52 = vpop.f32.mrf.mxu1 }
 0x1eb   : > { %v1313_v40 = vpack.c.bf16 %v1266_v39, %v1265_v38  ;;  %v1123_v43 = vadd.f32 %v2584_v27, %v1122_v52  ;;  %v1271_v47 = vmax.f32 %v1131_v44, 0.0 }
 0x1ec   : > { %v2106_v41 = vpop.f32.mrf.mxu1 }
 0x1ed   : > { %v1134_v46 = vadd.f32 %v2106_v41, %v2584_v27  ;;  %2179 = vmatprep.mubr.bf16.mxu0 %v1313_v40  ;;  %v1269_v24 = vmax.f32 %v1123_v43, 0.0 }
 0x1ee   : > { %v1125_v48 = vpop.f32.mrf.mxu1  ;;  %2180 = vmatmul.mubr.bf16.gmra.mxu0 %v1314_v17 }
 0x1ef   : > { %v1126_v4 = vadd.f32 %v2584_v27, %v1125_v48  ;;  %v1272_v49 = vmax.f32 %v1134_v46, 0.0 }
 0x1f0   : > { %v2109_v50 = vpop.f32.mrf.mxu1 }
 0x1f1   : > { %v1270_v37 = vmax.f32 %v1126_v4, 0.0  ;;  %v1316_v54 = vpack.c.bf16 %v1272_v49, %v1271_v47  ;;  %v1147_v60 = vadd.f32 %v2109_v50, %v2584_v27 }
 0x1f2   : > { %v1138_v51 = vpop.f32.mrf.mxu1 }
 0x1f3   : > { %v1315_v53 = vpack.c.bf16 %v1270_v37, %v1269_v24  ;;  %v1139_v56 = vadd.f32 %v2584_v27, %v1138_v51  ;;  %v1275_v58 = vmax.f32 %v1147_v60, 0.0 }
 0x1f4   : > { %v2110_v55 = vpop.f32.mrf.mxu1 }
 0x1f5   : > { %v1150_v59 = vadd.f32 %v2110_v55, %v2584_v27  ;;  %2183 = vmatprep.mubr.bf16.mxu0 %v1315_v53  ;;  %v1273_v1 = vmax.f32 %v1139_v56, 0.0 }
 0x1f6   : > { %v1141_v62 = vpop.f32.mrf.mxu1  ;;  %2184 = vmatmul.mubr.bf16.gmra.mxu0 %v1316_v54 }
 0x1f7   : > { %v1142_v63 = vadd.f32 %v2584_v27, %v1141_v62  ;;  %v1276_v0 = vmax.f32 %v1150_v59, 0.0 }
 0x1f8   : > { %v2113_v45 = vpop.f32.mrf.mxu1 }
 0x1f9   : > { %v1274_v2 = vmax.f32 %v1142_v63, 0.0  ;;  %v1318_v5 = vpack.c.bf16 %v1276_v0, %v1275_v58  ;;  %v1163_v9 = vadd.f32 %v2113_v45, %v2584_v27 }
 0x1fa   : > { %v1154_v14 = vpop.f32.mrf.mxu1 }
 0x1fb   : > { %v1317_v3 = vpack.c.bf16 %v1274_v2, %v1273_v1  ;;  %v1155_v6 = vadd.f32 %v2584_v27, %v1154_v14  ;;  %v1279_v57 = vmax.f32 %v1163_v9, 0.0 }
 0x1fc   : > { %v2114_v12 = vpop.f32.mrf.mxu1 }
 0x1fd   : > { %v1166_v8 = vadd.f32 %v2114_v12, %v2584_v27  ;;  %2187 = vmatprep.mubr.bf16.mxu0 %v1317_v3  ;;  %v1277_v34 = vmax.f32 %v1155_v6, 0.0 }
 0x1fe   : > { %v1157_v10 = vpop.f32.mrf.mxu1  ;;  %2188 = vmatmul.mubr.bf16.gmra.mxu0 %v1318_v5 }
 0x1ff   : > { %v1158_v11 = vadd.f32 %v2584_v27, %v1157_v10  ;;  %v1280_v13 = vmax.f32 %v1166_v8, 0.0 }
 0x200   : > { %v2117_v15 = vpop.f32.mrf.mxu1 }
 0x201   : > { %v1278_v16 = vmax.f32 %v1158_v11, 0.0  ;;  %v1320_v21 = vpack.c.bf16 %v1280_v13, %v1279_v57  ;;  %v1179_v26 = vadd.f32 %v2117_v15, %v2584_v27  ;;  %v2653_v11 = vld [vmem:[%s2863_s6] ss:$0 sm:$0xff] }
 0x202   : > { %v1170_v18 = vpop.f32.mrf.mxu1 }
 0x203   : > { %v1319_v20 = vpack.c.bf16 %v1278_v16, %v1277_v34  ;;  %v1171_v25 = vadd.f32 %v2584_v27, %v1170_v18  ;;  %v1283_v30 = vmax.f32 %v1179_v26, 0.0 }
 0x204   : > { %v2118_v23 = vpop.f32.mrf.mxu1 }
 0x205   : > { %v1182_v22 = vadd.f32 %v2118_v23, %v2584_v27  ;;  %2191 = vmatprep.mubr.bf16.mxu0 %v1319_v20  ;;  %v1281_v7 = vmax.f32 %v1171_v25, 0.0 }
 0x206   : > { %v1173_v32 = vpop.f32.mrf.mxu1  ;;  %2192 = vmatmul.mubr.bf16.gmra.mxu0 %v1320_v21 }
 0x207   : > { %v1174_v61 = vadd.f32 %v2584_v27, %v1173_v32  ;;  %v1284_v28 = vmax.f32 %v1182_v22, 0.0 }
 0x208   : > { %v2121_v19 = vpop.f32.mrf.mxu1 }
 0x209   : > { %v1282_v29 = vmax.f32 %v1174_v61, 0.0  ;;  %v1322_v35 = vpack.c.bf16 %v1284_v28, %v1283_v30  ;;  %v1195_v42 = vadd.f32 %v2121_v19, %v2584_v27 }
 0x20a   : > { %v1186_v31 = vpop.f32.mrf.mxu1 }
 0x20b   : > { %v1321_v33 = vpack.c.bf16 %v1282_v29, %v1281_v7  ;;  %v1187_v38 = vadd.f32 %v2584_v27, %v1186_v31  ;;  %v1287_v44 = vmax.f32 %v1195_v42, 0.0 }
 0x20c   : > { %v2122_v36 = vpop.f32.mrf.mxu1 }
 0x20d   : > { %v1198_v39 = vadd.f32 %v2122_v36, %v2584_v27  ;;  %2195 = vmatprep.mubr.bf16.mxu0 %v1321_v33  ;;  %v1285_v43 = vmax.f32 %v1187_v38, 0.0 }
 0x20e   : > { %v1189_v52 = vpop.f32.mrf.mxu1  ;;  %2196 = vmatmul.mubr.bf16.gmra.mxu0 %v1322_v35 }
 0x20f   : > { %v1190_v40 = vadd.f32 %v2584_v27, %v1189_v52  ;;  %v1288_v17 = vmax.f32 %v1198_v39, 0.0 }
 0x210   : > { %v2125_v41 = vpop.f32.mrf.mxu1 }
 0x211   : > { %v1286_v46 = vmax.f32 %v1190_v40, 0.0  ;;  %v1324_v49 = vpack.c.bf16 %v1288_v17, %v1287_v44  ;;  %v1211_v47 = vadd.f32 %v2125_v41, %v2584_v27 }
 0x212   : > { %v1202_v48 = vpop.f32.mrf.mxu1 }
 0x213   : > { %v1323_v4 = vpack.c.bf16 %v1286_v46, %v1285_v43  ;;  %v1203_v24 = vadd.f32 %v2584_v27, %v1202_v48  ;;  %v1291_v60 = vmax.f32 %v1211_v47, 0.0 }
 0x214   : > { %v2126_v50 = vpop.f32.mrf.mxu1 }
 0x215   : > { %v1214_v37 = vadd.f32 %v2126_v50, %v2584_v27  ;;  %2199 = vmatprep.mubr.bf16.mxu0 %v1323_v4  ;;  %v1289_v56 = vmax.f32 %v1203_v24, 0.0 }
 0x216   : > { %v1205_v51 = vpop.f32.mrf.mxu1  ;;  %2200 = vmatmul.mubr.bf16.gmra.mxu0 %v1324_v49 }
 0x217   : > { %v1206_v53 = vadd.f32 %v2584_v27, %v1205_v51  ;;  %v1292_v54 = vmax.f32 %v1214_v37, 0.0 }
 0x218   : > { %v2129_v55 = vpop.f32.mrf.mxu1 }
 0x219   : > { %v1290_v59 = vmax.f32 %v1206_v53, 0.0  ;;  %v1326_v0 = vpack.c.bf16 %v1292_v54, %v1291_v60  ;;  %v1227_v58 = vadd.f32 %v2129_v55, %v2584_v27 }
 0x21a   : > { %v1218_v62 = vpop.f32.mrf.mxu1 }
 0x21b   : > { %v1325_v63 = vpack.c.bf16 %v1290_v59, %v1289_v56  ;;  %v1219_v1 = vadd.f32 %v2584_v27, %v1218_v62  ;;  %v1295_v8 = vmax.f32 %v1227_v58, 0.0 }
 0x21c   : > { %v2130_v45 = vpop.f32.mrf.mxu1 }
 0x21d   : > { %v1230_v2 = vadd.f32 %v2130_v45, %v2584_v27  ;;  %2203 = vmatprep.mubr.bf16.mxu0 %v1325_v63  ;;  %v1293_v12 = vmax.f32 %v1219_v1, 0.0 }
 0x21e   : > { %v1221_v14 = vpop.f32.mrf.mxu1  ;;  %2204 = vmatmul.mubr.bf16.gmra.mxu0 %v1326_v0 }
 0x21f   : > { %v1222_v3 = vadd.f32 %v2584_v27, %v1221_v14  ;;  %v1296_v5 = vmax.f32 %v1230_v2, 0.0 }
 0x221   : > { %v1294_v6 = vmax.f32 %v1222_v3, 0.0  ;;  %v1328_v10 = vpack.c.bf16 %v1296_v5, %v1295_v8 }
 0x223   : > { %v1327_v9 = vpack.c.bf16 %v1294_v6, %v1293_v12 }
 0x225   : > { %2207 = vmatprep.mubr.bf16.mxu0 %v1327_v9 }
 0x226   : > { %2208 = vmatmul.mubr.bf16.gmra.mxu0 %v1328_v10 }
 0x26e   : > { %v2149_v27 = vpop.f32.mrf.mxu0 }
 0x26f   : > { %v1443_v13 = vadd.f32 %v2149_v27, %v2653_v11 }
 0x270   : > { %v1434_v15 = vpop.f32.mrf.mxu0 }
 0x271   : > { %1692 = vst.msk [vmem:[%s2660_s10 + $0x10] sm:$0xff] %vm1689_vm2, %v1443_v13  ;;  %v1435_v34 = vadd.f32 %v2653_v11, %v1434_v15 }
 0x272   : > { %v2150_v16 = vpop.f32.mrf.mxu0 }
 0x273   : > { %1690 = vst.msk [vmem:[%s2660_s10] sm:$0xff] %vm1689_vm2, %v1435_v34  ;;  %v1446_v57 = vadd.f32 %v2150_v16, %v2653_v11 }
 0x274   : > { %v1437_v18 = vpop.f32.mrf.mxu0 }
 0x275   : > { %1693 = vst.msk [vmem:[%s2660_s10 + $0x18] sm:$0xff] %vm1689_vm2, %v1446_v57  ;;  %v1438_v20 = vadd.f32 %v2653_v11, %v1437_v18 }
 0x276   : > { %v2153_v21 = vpop.f32.mrf.mxu0 }
 0x277   : > { %1691 = vst.msk [vmem:[%s2660_s10 + $0x8] sm:$0xff] %vm1689_vm2, %v1438_v20  ;;  %v1459_v23 = vadd.f32 %v2153_v21, %v2653_v11 }
 0x278   : > { %v1450_v25 = vpop.f32.mrf.mxu0 }
 0x279   : > { %1696 = vst.msk [vmem:[%s2660_s10 + $0x30] sm:$0xff] %vm1689_vm2, %v1459_v23  ;;  %v1451_v22 = vadd.f32 %v2653_v11, %v1450_v25 }
 0x27a   : > { %v2154_v26 = vpop.f32.mrf.mxu0 }
 0x27b   : > { %1694 = vst.msk [vmem:[%s2660_s10 + $0x20] sm:$0xff] %vm1689_vm2, %v1451_v22  ;;  %v1462_v32 = vadd.f32 %v2154_v26, %v2653_v11 }
 0x27c   : > { %v1453_v61 = vpop.f32.mrf.mxu0 }
 0x27d   : > { %1697 = vst.msk [vmem:[%s2660_s10 + $0x38] sm:$0xff] %vm1689_vm2, %v1462_v32  ;;  %v1454_v28 = vadd.f32 %v2653_v11, %v1453_v61 }
 0x27e   : > { %v2157_v19 = vpop.f32.mrf.mxu0 }
 0x27f   : > { %1695 = vst.msk [vmem:[%s2660_s10 + $0x28] sm:$0xff] %vm1689_vm2, %v1454_v28  ;;  %v1475_v7 = vadd.f32 %v2157_v19, %v2653_v11 }
 0x280   : > { %v1466_v29 = vpop.f32.mrf.mxu0 }
 0x281   : > { %1700 = vst.msk [vmem:[%s2660_s10 + $0x50] sm:$0xff] %vm1689_vm2, %v1475_v7  ;;  %v1467_v30 = vadd.f32 %v2653_v11, %v1466_v29 }
 0x282   : > { %v2158_v31 = vpop.f32.mrf.mxu0 }
 0x283   : > { %1698 = vst.msk [vmem:[%s2660_s10 + $0x40] sm:$0xff] %vm1689_vm2, %v1467_v30  ;;  %v1478_v33 = vadd.f32 %v2158_v31, %v2653_v11 }
 0x284   : > { %v1469_v35 = vpop.f32.mrf.mxu0 }
 0x285   : > { %1701 = vst.msk [vmem:[%s2660_s10 + $0x58] sm:$0xff] %vm1689_vm2, %v1478_v33  ;;  %v1470_v36 = vadd.f32 %v2653_v11, %v1469_v35 }
 0x286   : > { %v2161_v38 = vpop.f32.mrf.mxu0 }
 0x287   : > { %1699 = vst.msk [vmem:[%s2660_s10 + $0x48] sm:$0xff] %vm1689_vm2, %v1470_v36  ;;  %v1491_v39 = vadd.f32 %v2161_v38, %v2653_v11 }
 0x288   : > { %v1482_v42 = vpop.f32.mrf.mxu0 }
 0x289   : > { %1704 = vst.msk [vmem:[%s2660_s10 + $0x70] sm:$0xff] %vm1689_vm2, %v1491_v39  ;;  %v1483_v52 = vadd.f32 %v2653_v11, %v1482_v42 }
 0x28a   : > { %v2162_v40 = vpop.f32.mrf.mxu0 }
 0x28b   : > { %1702 = vst.msk [vmem:[%s2660_s10 + $0x60] sm:$0xff] %vm1689_vm2, %v1483_v52  ;;  %v1494_v17 = vadd.f32 %v2162_v40, %v2653_v11 }
 0x28c   : > { %v1485_v41 = vpop.f32.mrf.mxu0 }
 0x28d   : > { %1705 = vst.msk [vmem:[%s2660_s10 + $0x78] sm:$0xff] %vm1689_vm2, %v1494_v17  ;;  %v1486_v43 = vadd.f32 %v2653_v11, %v1485_v41 }
 0x28e   : > { %v2165_v46 = vpop.f32.mrf.mxu0 }
 0x28f   : > { %1703 = vst.msk [vmem:[%s2660_s10 + $0x68] sm:$0xff] %vm1689_vm2, %v1486_v43  ;;  %v1507_v44 = vadd.f32 %v2165_v46, %v2653_v11 }
 0x290   : > { %v1498_v48 = vpop.f32.mrf.mxu0 }
 0x291   : > { %1708 = vst.msk [vmem:[%s2660_s10 + $0x90] sm:$0xff] %vm1689_vm2, %v1507_v44  ;;  %v1499_v4 = vadd.f32 %v2653_v11, %v1498_v48 }
 0x292   : > { %v2166_v49 = vpop.f32.mrf.mxu0 }
 0x293   : > { %1706 = vst.msk [vmem:[%s2660_s10 + $0x80] sm:$0xff] %vm1689_vm2, %v1499_v4  ;;  %v1510_v50 = vadd.f32 %v2166_v49, %v2653_v11 }
 0x294   : > { %v1501_v24 = vpop.f32.mrf.mxu0 }
 0x295   : > { %1709 = vst.msk [vmem:[%s2660_s10 + $0x98] sm:$0xff] %vm1689_vm2, %v1510_v50  ;;  %v1502_v37 = vadd.f32 %v2653_v11, %v1501_v24 }
 0x296   : > { %v2169_v47 = vpop.f32.mrf.mxu0 }
 0x297   : > { %1707 = vst.msk [vmem:[%s2660_s10 + $0x88] sm:$0xff] %vm1689_vm2, %v1502_v37  ;;  %v1523_v51 = vadd.f32 %v2169_v47, %v2653_v11 }
 0x298   : > { %v1514_v53 = vpop.f32.mrf.mxu0 }
 0x299   : > { %1712 = vst.msk [vmem:[%s2660_s10 + $0xb0] sm:$0xff] %vm1689_vm2, %v1523_v51  ;;  %v1515_v54 = vadd.f32 %v2653_v11, %v1514_v53 }
 0x29a   : > { %v2170_v55 = vpop.f32.mrf.mxu0 }
 0x29b   : > { %1710 = vst.msk [vmem:[%s2660_s10 + $0xa0] sm:$0xff] %vm1689_vm2, %v1515_v54  ;;  %v1526_v56 = vadd.f32 %v2170_v55, %v2653_v11 }
 0x29c   : > { %v1517_v59 = vpop.f32.mrf.mxu0 }
 0x29d   : > { %1713 = vst.msk [vmem:[%s2660_s10 + $0xb8] sm:$0xff] %vm1689_vm2, %v1526_v56  ;;  %v1518_v60 = vadd.f32 %v2653_v11, %v1517_v59 }
 0x29e   : > { %v2173_v62 = vpop.f32.mrf.mxu0 }
 0x29f   : > { %1711 = vst.msk [vmem:[%s2660_s10 + $0xa8] sm:$0xff] %vm1689_vm2, %v1518_v60  ;;  %v1539_v63 = vadd.f32 %v2173_v62, %v2653_v11 }
 0x2a0   : > { %v1530_v0 = vpop.f32.mrf.mxu0 }
 0x2a1   : > { %1716 = vst.msk [vmem:[%s2660_s10 + $0xd0] sm:$0xff] %vm1689_vm2, %v1539_v63  ;;  %v1531_v45 = vadd.f32 %v2653_v11, %v1530_v0 }
 0x2a2   : > { %v2174_v1 = vpop.f32.mrf.mxu0 }
 0x2a3   : > { %1714 = vst.msk [vmem:[%s2660_s10 + $0xc0] sm:$0xff] %vm1689_vm2, %v1531_v45  ;;  %v1542_v2 = vadd.f32 %v2174_v1, %v2653_v11 }
 0x2a4   : > { %v1533_v58 = vpop.f32.mrf.mxu0 }
 0x2a5   : > { %1717 = vst.msk [vmem:[%s2660_s10 + $0xd8] sm:$0xff] %vm1689_vm2, %v1542_v2  ;;  %v1534_v14 = vadd.f32 %v2653_v11, %v1533_v58 }
 0x2a6   : > { %v2177_v3 = vpop.f32.mrf.mxu0 }
 0x2a7   : > { %1715 = vst.msk [vmem:[%s2660_s10 + $0xc8] sm:$0xff] %vm1689_vm2, %v1534_v14  ;;  %v1555_v5 = vadd.f32 %v2177_v3, %v2653_v11 }
 0x2a8   : > { %v1546_v12 = vpop.f32.mrf.mxu0 }
 0x2a9   : > { %1720 = vst.msk [vmem:[%s2660_s10 + $0xf0] sm:$0xff] %vm1689_vm2, %v1555_v5  ;;  %v1547_v6 = vadd.f32 %v2653_v11, %v1546_v12 }
 0x2aa   : > { %v2178_v8 = vpop.f32.mrf.mxu0 }
 0x2ab   : > { %1718 = vst.msk [vmem:[%s2660_s10 + $0xe0] sm:$0xff] %vm1689_vm2, %v1547_v6  ;;  %v1558_v9 = vadd.f32 %v2178_v8, %v2653_v11 }
 0x2ac   : > { %v1549_v10 = vpop.f32.mrf.mxu0 }
 0x2ad   : > { %1721 = vst.msk [vmem:[%s2660_s10 + $0xf8] sm:$0xff] %vm1689_vm2, %v1558_v9  ;;  %v1550_v27 = vadd.f32 %v2653_v11, %v1549_v10 }
 0x2ae   : > { %v2181_v13 = vpop.f32.mrf.mxu0 }
 0x2af   : > { %1719 = vst.msk [vmem:[%s2660_s10 + $0xe8] sm:$0xff] %vm1689_vm2, %v1550_v27  ;;  %v1571_v15 = vadd.f32 %v2181_v13, %v2653_v11 }
 0x2b0   : > { %v1562_v34 = vpop.f32.mrf.mxu0 }
 0x2b1   : > { %1724 = vst.msk [vmem:[%s2660_s10 + $0x110] sm:$0xff] %vm1689_vm2, %v1571_v15  ;;  %v1563_v16 = vadd.f32 %v2653_v11, %v1562_v34 }
 0x2b2   : > { %v2182_v57 = vpop.f32.mrf.mxu0 }
 0x2b3   : > { %1722 = vst.msk [vmem:[%s2660_s10 + $0x100] sm:$0xff] %vm1689_vm2, %v1563_v16  ;;  %v1574_v18 = vadd.f32 %v2182_v57, %v2653_v11 }
 0x2b4   : > { %v1565_v20 = vpop.f32.mrf.mxu0 }
 0x2b5   : > { %1725 = vst.msk [vmem:[%s2660_s10 + $0x118] sm:$0xff] %vm1689_vm2, %v1574_v18  ;;  %v1566_v21 = vadd.f32 %v2653_v11, %v1565_v20 }
 0x2b6   : > { %v2185_v23 = vpop.f32.mrf.mxu0 }
 0x2b7   : > { %1723 = vst.msk [vmem:[%s2660_s10 + $0x108] sm:$0xff] %vm1689_vm2, %v1566_v21  ;;  %v1587_v25 = vadd.f32 %v2185_v23, %v2653_v11 }
 0x2b8   : > { %v1578_v22 = vpop.f32.mrf.mxu0 }
 0x2b9   : > { %1728 = vst.msk [vmem:[%s2660_s10 + $0x130] sm:$0xff] %vm1689_vm2, %v1587_v25  ;;  %v1579_v26 = vadd.f32 %v2653_v11, %v1578_v22 }
 0x2ba   : > { %v2186_v32 = vpop.f32.mrf.mxu0 }
 0x2bb   : > { %1726 = vst.msk [vmem:[%s2660_s10 + $0x120] sm:$0xff] %vm1689_vm2, %v1579_v26  ;;  %v1590_v61 = vadd.f32 %v2186_v32, %v2653_v11 }
 0x2bc   : > { %v1581_v28 = vpop.f32.mrf.mxu0 }
 0x2bd   : > { %1729 = vst.msk [vmem:[%s2660_s10 + $0x138] sm:$0xff] %vm1689_vm2, %v1590_v61  ;;  %v1582_v19 = vadd.f32 %v2653_v11, %v1581_v28 }
 0x2be   : > { %v2189_v7 = vpop.f32.mrf.mxu0 }
 0x2bf   : > { %1727 = vst.msk [vmem:[%s2660_s10 + $0x128] sm:$0xff] %vm1689_vm2, %v1582_v19  ;;  %v1603_v29 = vadd.f32 %v2189_v7, %v2653_v11 }
 0x2c0   : > { %v1594_v30 = vpop.f32.mrf.mxu0 }
 0x2c1   : > { %1732 = vst.msk [vmem:[%s2660_s10 + $0x150] sm:$0xff] %vm1689_vm2, %v1603_v29  ;;  %v1595_v31 = vadd.f32 %v2653_v11, %v1594_v30 }
 0x2c2   : > { %v2190_v33 = vpop.f32.mrf.mxu0 }
 0x2c3   : > { %1730 = vst.msk [vmem:[%s2660_s10 + $0x140] sm:$0xff] %vm1689_vm2, %v1595_v31  ;;  %v1606_v35 = vadd.f32 %v2190_v33, %v2653_v11 }
 0x2c4   : > { %v1597_v36 = vpop.f32.mrf.mxu0 }
 0x2c5   : > { %1733 = vst.msk [vmem:[%s2660_s10 + $0x158] sm:$0xff] %vm1689_vm2, %v1606_v35  ;;  %v1598_v38 = vadd.f32 %v2653_v11, %v1597_v36 }
 0x2c6   : > { %v2193_v39 = vpop.f32.mrf.mxu0 }
 0x2c7   : > { %1731 = vst.msk [vmem:[%s2660_s10 + $0x148] sm:$0xff] %vm1689_vm2, %v1598_v38  ;;  %v1619_v42 = vadd.f32 %v2193_v39, %v2653_v11 }
 0x2c8   : > { %v1610_v52 = vpop.f32.mrf.mxu0 }
 0x2c9   : > { %1736 = vst.msk [vmem:[%s2660_s10 + $0x170] sm:$0xff] %vm1689_vm2, %v1619_v42  ;;  %v1611_v40 = vadd.f32 %v2653_v11, %v1610_v52 }
 0x2ca   : > { %v2194_v17 = vpop.f32.mrf.mxu0 }
 0x2cb   : > { %1734 = vst.msk [vmem:[%s2660_s10 + $0x160] sm:$0xff] %vm1689_vm2, %v1611_v40  ;;  %v1622_v41 = vadd.f32 %v2194_v17, %v2653_v11 }
 0x2cc   : > { %v1613_v43 = vpop.f32.mrf.mxu0 }
 0x2cd   : > { %1737 = vst.msk [vmem:[%s2660_s10 + $0x178] sm:$0xff] %vm1689_vm2, %v1622_v41  ;;  %v1614_v46 = vadd.f32 %v2653_v11, %v1613_v43 }
 0x2ce   : > { %v2197_v44 = vpop.f32.mrf.mxu0 }
 0x2cf   : > { %1735 = vst.msk [vmem:[%s2660_s10 + $0x168] sm:$0xff] %vm1689_vm2, %v1614_v46  ;;  %v1635_v48 = vadd.f32 %v2197_v44, %v2653_v11 }
 0x2d0   : > { %v1626_v4 = vpop.f32.mrf.mxu0 }
 0x2d1   : > { %1740 = vst.msk [vmem:[%s2660_s10 + $0x190] sm:$0xff] %vm1689_vm2, %v1635_v48  ;;  %v1627_v49 = vadd.f32 %v2653_v11, %v1626_v4 }
 0x2d2   : > { %v2198_v50 = vpop.f32.mrf.mxu0 }
 0x2d3   : > { %1738 = vst.msk [vmem:[%s2660_s10 + $0x180] sm:$0xff] %vm1689_vm2, %v1627_v49  ;;  %v1638_v24 = vadd.f32 %v2198_v50, %v2653_v11 }
 0x2d4   : > { %v1629_v37 = vpop.f32.mrf.mxu0 }
 0x2d5   : > { %1741 = vst.msk [vmem:[%s2660_s10 + $0x198] sm:$0xff] %vm1689_vm2, %v1638_v24  ;;  %v1630_v47 = vadd.f32 %v2653_v11, %v1629_v37 }
 0x2d6   : > { %v2201_v51 = vpop.f32.mrf.mxu0 }
 0x2d7   : > { %1739 = vst.msk [vmem:[%s2660_s10 + $0x188] sm:$0xff] %vm1689_vm2, %v1630_v47  ;;  %v1651_v53 = vadd.f32 %v2201_v51, %v2653_v11 }
 0x2d8   : > { %v1642_v54 = vpop.f32.mrf.mxu0 }
 0x2d9   : > { %1744 = vst.msk [vmem:[%s2660_s10 + $0x1b0] sm:$0xff] %vm1689_vm2, %v1651_v53  ;;  %v1643_v55 = vadd.f32 %v2653_v11, %v1642_v54 }
 0x2da   : > { %v2202_v56 = vpop.f32.mrf.mxu0 }
 0x2db   : > { %1742 = vst.msk [vmem:[%s2660_s10 + $0x1a0] sm:$0xff] %vm1689_vm2, %v1643_v55  ;;  %v1654_v59 = vadd.f32 %v2202_v56, %v2653_v11 }
 0x2dc   : > { %v1645_v60 = vpop.f32.mrf.mxu0 }
 0x2dd   : > { %1745 = vst.msk [vmem:[%s2660_s10 + $0x1b8] sm:$0xff] %vm1689_vm2, %v1654_v59  ;;  %v1646_v62 = vadd.f32 %v2653_v11, %v1645_v60 }
 0x2de   : > { %v2205_v63 = vpop.f32.mrf.mxu0 }
 0x2df   : > { %1743 = vst.msk [vmem:[%s2660_s10 + $0x1a8] sm:$0xff] %vm1689_vm2, %v1646_v62  ;;  %v1667_v0 = vadd.f32 %v2205_v63, %v2653_v11 }
 0x2e0   : > { %v1658_v45 = vpop.f32.mrf.mxu0 }
 0x2e1   : > { %1748 = vst.msk [vmem:[%s2660_s10 + $0x1d0] sm:$0xff] %vm1689_vm2, %v1667_v0  ;;  %v1659_v1 = vadd.f32 %v2653_v11, %v1658_v45 }
 0x2e2   : > { %v2206_v2 = vpop.f32.mrf.mxu0 }
 0x2e3   : > { %1746 = vst.msk [vmem:[%s2660_s10 + $0x1c0] sm:$0xff] %vm1689_vm2, %v1659_v1  ;;  %v1670_v58 = vadd.f32 %v2206_v2, %v2653_v11 }
 0x2e4   : > { %v1661_v14 = vpop.f32.mrf.mxu0 }
 0x2e5   : > { %1749 = vst.msk [vmem:[%s2660_s10 + $0x1d8] sm:$0xff] %vm1689_vm2, %v1670_v58  ;;  %v1662_v3 = vadd.f32 %v2653_v11, %v1661_v14 }
 0x2e6   : > { %v2209_v5 = vpop.f32.mrf.mxu0 }
 0x2e7   : > { %1747 = vst.msk [vmem:[%s2660_s10 + $0x1c8] sm:$0xff] %vm1689_vm2, %v1662_v3  ;;  %v1683_v12 = vadd.f32 %v2209_v5, %v2653_v11 }
 0x2e8   : > { %v1674_v6 = vpop.f32.mrf.mxu0 }
 0x2e9   : > { %1752 = vst.msk [vmem:[%s2660_s10 + $0x1f0] sm:$0xff] %vm1689_vm2, %v1683_v12  ;;  %v1675_v8 = vadd.f32 %v2653_v11, %v1674_v6 }
 0x2ea   : > { %v2210_v9 = vpop.f32.mrf.mxu0 }
 0x2eb   : > { %1750 = vst.msk [vmem:[%s2660_s10 + $0x1e0] sm:$0xff] %vm1689_vm2, %v1675_v8  ;;  %v1686_v10 = vadd.f32 %v2210_v9, %v2653_v11 }
 0x2ec   : > { %v1677_v27 = vpop.f32.mrf.mxu0 }
 0x2ed   : > { %1753 = vst.msk [vmem:[%s2660_s10 + $0x1f8] sm:$0xff] %vm1689_vm2, %v1686_v10  ;;  %v1678_v13 = vadd.f32 %v2653_v11, %v1677_v27 }
 0x2ef   : > { %1751 = vst.msk [vmem:[%s2660_s10 + $0x1e8] sm:$0xff] %vm1689_vm2, %v1678_v13 }
 0x2f0 PF: > { %s17_s24 = sadd.s32 1, %s2245_s24  }
 0x2f1   : > { %p14_p4 = scmp.ge.s32.totalorder %s17_s24, 4  }
 0x2f3   :  { %16 = sbr.rel (!%p14_p4) target bundleno = 1 (0x1), region = 78 }

</bundles_post_ra>
